<compile_context>
chip_gen: v6e
topology: v6e:2x2x1
jax: 0.10.0
libtpu: 0.0.40
codegen_flags: <defaults>
</compile_context>

<pallas_src>
import math

import jax
import jax.numpy as jnp
from jax.experimental import pallas as pl
from jax.experimental.pallas import tpu as pltpu

LANE = 128  # lane width of the padded output slab (unmasked vst)


# ----------------------------------------------------------------------------
# Fused kernel: one batch element per grid step.
# Activations are transposed: (channels, pixels) with pixels on lanes.
# ----------------------------------------------------------------------------
def _fused_kernel(x_ref, w2a_ref, b2a_ref, w2d_ref, b2d_ref,
                  w3d_ref, b3d_ref, w3s_ref, b3s_ref,
                  bsel_ref, csel_ref, o_ref):
    f32 = jnp.float32
    bf16 = jnp.bfloat16

    xrow = x_ref[0]                                        # (1, M) f32, lane-dense

    # [conv2d_1a o conv2d_2a] folded: rank-1 affine map, pure VPU.
    a2 = w2a_ref[...] * xrow + b2a_ref[...]                # (256, M) f32

    # conv2d_2d: 256 -> 256   (MXU, bf16 in / f32 acc)
    a3 = jnp.dot(w2d_ref[...], a2.astype(bf16),
                 preferred_element_type=f32) + b2d_ref[...]      # (256, M)

    # conv2d_3d: 256 -> 256
    a4 = jnp.dot(w3d_ref[...], a3.astype(bf16),
                 preferred_element_type=f32) + b3d_ref[...]      # (256, M)

    # conv2d_3s: ConvTranspose2d(256, 1, 2) -- all 4 taps in one matmul.
    taps = jnp.dot(w3s_ref[...], a4.astype(bf16),
                   preferred_element_type=f32)                   # (4, M), t = 2*kh+kw
    tb = taps.astype(bf16)

    # Overlap-add via exact 0/1 selection (bf16) + one fused MXU matmul.
    b0 = bsel_ref[0]                                       # (Hpad, M), kh = 0
    b1 = bsel_ref[1]                                       # (Hpad, M), kh = 1
    lhs_kw0 = b0 * tb[0:1, :] + b1 * tb[2:3, :]            # (Hpad, M) bf16
    lhs_kw1 = b0 * tb[1:2, :] + b1 * tb[3:4, :]            # (Hpad, M) bf16
    lhs = jnp.concatenate([lhs_kw0, lhs_kw1], axis=1)      # (Hpad, 2M) bf16
    out = jnp.dot(lhs, csel_ref[...], preferred_element_type=f32)   # (Hpad, LANE)

    o_ref[0] = out + b3s_ref[...]                          # + bias, dense 128-lane store


# ----------------------------------------------------------------------------
# Wrapper: weight folding/reshapes, selection matrices, single pallas_call.
# ----------------------------------------------------------------------------
def model_forward(x_nchw, params):
    N, Cin, H, W = x_nchw.shape
    assert Cin == 1, "model expects a single input channel"
    M = H * W
    K = 2                                   # conv2d_3s kernel size
    Hout, Wout = H + K - 1, W + K - 1
    Hpad = ((Hout + 7) // 8) * 8            # pad output rows to a sublane multiple
    assert Wout <= LANE, "spatial width too large for the padded output slab"
    assert M % 8 == 0

    w1a, b1a = params["1a"]
    w2a, b2a = params["2a"]
    w2d, b2d = params["2d"]
    w3d, b3d = params["3d"]
    w3s, b3s = params["3s"]

    # --- fold conv2d_1a into conv2d_2a (exact, f32) --------------------------
    w1a_col = w1a[:, :, 0, 0].T.astype(jnp.float32)        # (128, 1)
    b1a_col = b1a.reshape(-1, 1).astype(jnp.float32)       # (128, 1)
    w2a_f = w2a[:, :, 0, 0].T.astype(jnp.float32)          # (256, 128)
    w2a_fold = w2a_f @ w1a_col                             # (256, 1)
    b2a_fold = w2a_f @ b1a_col + b2a.reshape(-1, 1).astype(jnp.float32)   # (256, 1)

    # --- remaining weights: rows = out channels, cols = in channels ----------
    w2dT = w2d[:, :, 0, 0].T.astype(jnp.bfloat16)          # (256, 256)
    b2d_col = b2d.reshape(-1, 1).astype(jnp.float32)
    w3dT = w3d[:, :, 0, 0].T.astype(jnp.bfloat16)          # (256, 256)
    b3d_col = b3d.reshape(-1, 1).astype(jnp.float32)
    # taps: t = 2*kh + kw  ->  w3sT[t, c] = w3s[c, 0, kh, kw]
    w3sT = w3s[:, 0].reshape(w3s.shape[0], K * K).T.astype(jnp.bfloat16)  # (4, 256)
    b3s_row = jnp.full((1, LANE), b3s[0], jnp.float32)

    # 0/1 selection operands for the 2x2 overlap-add (exact in bf16):
    #   bsel[kh, i, p]   = 1  iff  p // W == i - kh        (rows >= Hout are all-zero)
    #   csel_cat[kw*M+p, w] = 1  iff  p %  W == w - kw
    p = jnp.arange(M)
    i_out = jnp.arange(Hpad)
    w_out = jnp.arange(LANE)
    kidx = jnp.arange(K)
    bsel = ((p // W)[None, None, :] ==
            (i_out[None, :, None] - kidx[:, None, None])).astype(jnp.bfloat16)   # (2, Hpad, M)
    csel = ((p % W)[None, :, None] ==
            (w_out[None, None, :] - kidx[:, None, None])).astype(jnp.bfloat16)   # (2, M, LANE)
    csel_cat = csel.reshape(K * M, LANE)    # rows [0:M] = kw0, [M:2M] = kw1

    x_flat = x_nchw.reshape(N, 1, M).astype(jnp.float32)

    # Advisory cost model for XLA's scheduler.
    flops_per_n = (2 * 256 * M                      # folded rank-1 stage
                   + 2 * 2 * 256 * 256 * M          # 2d, 3d
                   + 2 * 4 * 256 * M                # 3s taps
                   + 4 * Hpad * M                   # overlap-add VPU work
                   + 2 * Hpad * (2 * M) * LANE)     # fused selection matmul
    weight_bytes = ((w2dT.size + w3dT.size + w3sT.size + csel_cat.size + bsel.size) * 2
                    + (w2a_fold.size + b2a_fold.size + b2d_col.size
                       + b3d_col.size + b3s_row.size) * 4)
    cost = pl.CostEstimate(flops=int(N * flops_per_n), transcendentals=0,
                           bytes_accessed=int(weight_bytes + N * M * 4
                                              + N * Hpad * LANE * 4))

    def full_spec(arr):
        nd = arr.ndim
        return pl.BlockSpec(arr.shape, lambda n, _nd=nd: (0,) * _nd)

    out_pad = pl.pallas_call(
        _fused_kernel,
        out_shape=jax.ShapeDtypeStruct((N, Hpad, LANE), jnp.float32),
        grid_spec=pltpu.PrefetchScalarGridSpec(
            num_scalar_prefetch=0,
            grid=(N,),
            in_specs=[
                pl.BlockSpec((1, 1, M), lambda n: (n, 0, 0)),   # x
                full_spec(w2a_fold), full_spec(b2a_fold),
                full_spec(w2dT), full_spec(b2d_col),
                full_spec(w3dT), full_spec(b3d_col),
                full_spec(w3sT), full_spec(b3s_row),
                full_spec(bsel), full_spec(csel_cat),
            ],
            out_specs=pl.BlockSpec((1, Hpad, LANE), lambda n: (n, 0, 0)),
        ),
        compiler_params=pltpu.CompilerParams(
            dimension_semantics=("parallel",)),
        cost_estimate=cost,
    )(x_flat, w2a_fold, b2a_fold, w2dT, b2d_col, w3dT, b3d_col,
      w3sT, b3s_row, bsel, csel_cat)

    out = out_pad[:, :Hout, :Wout]         # crop row/lane padding -> (N, Hout, Wout)
    return out[:, None, :, :]              # NCHW: (N, 1, Hout, Wout)


# ----------------------------------------------------------------------------
# Pure-JAX f32 reference of the valid chain (for a loose correctness check).
# ----------------------------------------------------------------------------
def _ref_forward(x_nchw, params):
    N, _, H, W = x_nchw.shape
    M = H * W
    a = x_nchw.reshape(N, 1, M).astype(jnp.float32)

    def ct1x1(act, wb):
        w, b = wb
        wT = w[:, :, 0, 0].T.astype(jnp.float32)           # (Cout, Cin)
        return jnp.einsum("oc,ncm->nom", wT, act) + b.astype(jnp.float32)[None, :, None]

    a = ct1x1(a, params["1a"])
    a = ct1x1(a, params["2a"])
    a = ct1x1(a, params["2d"])
    a = ct1x1(a, params["3d"])
    w3s, b3s = params["3s"]
    a = a.reshape(N, a.shape[1], H, W)
    out = jnp.zeros((N, H + 1, W + 1), jnp.float32)
    for kh in range(2):
        for kw in range(2):
            contrib = jnp.einsum("c,nchw->nhw",
                                 w3s[:, 0, kh, kw].astype(jnp.float32), a)
            out = out.at[:, kh:kh + H, kw:kw + W].add(contrib)
    return (out + b3s[0])[:, None]


# ----------------------------------------------------------------------------
# Deterministic parameter init (mirrors the module's __init__ shapes).
# ----------------------------------------------------------------------------
def _init_convt(key, cin, cout, k):
    kw, kb = jax.random.split(key)
    bound = 1.0 / math.sqrt(cin * k * k)
    w = jax.random.uniform(kw, (cin, cout, k, k), jnp.float32, -bound, bound)
    b = jax.random.uniform(kb, (cout,), jnp.float32, -bound, bound)
    return w, b


def build_params():
    keys = jax.random.split(jax.random.PRNGKey(42), 8)
    return {
        "1a": _init_convt(keys[0], 1, 128, 1),
        "2a": _init_convt(keys[1], 128, 256, 1),
        "1d": _init_convt(keys[2], 128, 64, 1),    # unused (invalid ref graph)
        "2d": _init_convt(keys[3], 256, 256, 1),
        "3d": _init_convt(keys[4], 256, 256, 1),
        "1s": _init_convt(keys[5], 64, 1, 3),      # unused (invalid ref graph)
        "2s": _init_convt(keys[6], 256, 128, 3),   # unused (invalid ref graph)
        "3s": _init_convt(keys[7], 256, 1, 2),
    }


if __name__ == "__main__":
    params = build_params()
    x = jax.random.normal(jax.random.PRNGKey(0), (2, 1, 16, 16), jnp.float32)

    fwd = jax.jit(model_forward)
    y = fwd(x, params)
    jax.block_until_ready(y)

    assert y.shape == (2, 1, 17, 17), y.shape
    assert bool(jnp.all(jnp.isfinite(y)))

    # Loose check vs. f32 reference (the kernel runs the 256-wide stages in
    # bf16 on the MXU, so expect ~1e-2-scale absolute differences at most).
    y_ref = _ref_forward(x, params)
    max_err = float(jnp.max(jnp.abs(y - y_ref)))
    assert max_err < 5e-2, f"max abs err vs f32 reference too large: {max_err}"

    print("KERNEL_OK")
</pallas_src>

<mosaic_0001>
module attributes {stable_mosaic.version = 11 : i64} {
  func.func @_fused_kernel(%arg0: i32, %arg1: memref<1x1x256xf32, #tpu.memory_space<vmem>>, %arg2: memref<256x1xf32, #tpu.memory_space<vmem>>, %arg3: memref<256x1xf32, #tpu.memory_space<vmem>>, %arg4: memref<256x256xbf16, #tpu.memory_space<vmem>>, %arg5: memref<256x1xf32, #tpu.memory_space<vmem>>, %arg6: memref<256x256xbf16, #tpu.memory_space<vmem>>, %arg7: memref<256x1xf32, #tpu.memory_space<vmem>>, %arg8: memref<4x256xbf16, #tpu.memory_space<vmem>>, %arg9: memref<1x128xf32, #tpu.memory_space<vmem>>, %arg10: memref<2x24x256xbf16, #tpu.memory_space<vmem>>, %arg11: memref<512x128xbf16, #tpu.memory_space<vmem>>, %arg12: memref<1x24x128xf32, #tpu.memory_space<vmem>>) attributes {dimension_semantics = [#tpu.dimension_semantics<parallel>], iteration_bounds = array<i64: 2>, scalar_prefetch = 0 : i64, scratch_operands = 0 : i64, tpu.core_type = #tpu.core_type<tc>, window_params = [{transform_indices = @transform_0, window_bounds = array<i64: 1, 1, 256>}, {pipeline_mode = #tpu.pipeline_mode<synchronous>, transform_indices = @transform_1, window_bounds = array<i64: 256, 1>}, {pipeline_mode = #tpu.pipeline_mode<synchronous>, transform_indices = @transform_2, window_bounds = array<i64: 256, 1>}, {pipeline_mode = #tpu.pipeline_mode<synchronous>, transform_indices = @transform_3, window_bounds = array<i64: 256, 256>}, {pipeline_mode = #tpu.pipeline_mode<synchronous>, transform_indices = @transform_4, window_bounds = array<i64: 256, 1>}, {pipeline_mode = #tpu.pipeline_mode<synchronous>, transform_indices = @transform_5, window_bounds = array<i64: 256, 256>}, {pipeline_mode = #tpu.pipeline_mode<synchronous>, transform_indices = @transform_6, window_bounds = array<i64: 256, 1>}, {pipeline_mode = #tpu.pipeline_mode<synchronous>, transform_indices = @transform_7, window_bounds = array<i64: 4, 256>}, {pipeline_mode = #tpu.pipeline_mode<synchronous>, transform_indices = @transform_8, window_bounds = array<i64: 1, 128>}, {pipeline_mode = #tpu.pipeline_mode<synchronous>, transform_indices = @transform_9, window_bounds = array<i64: 2, 24, 256>}, {pipeline_mode = #tpu.pipeline_mode<synchronous>, transform_indices = @transform_10, window_bounds = array<i64: 512, 128>}, {transform_indices = @transform_11, window_bounds = array<i64: 1, 24, 128>}]} {
    %c0 = arith.constant 0 : index
    %c0_0 = arith.constant 0 : index
    %c0_1 = arith.constant 0 : index
    %0 = vector.load %arg1[%c0, %c0_0, %c0_1] : memref<1x1x256xf32, #tpu.memory_space<vmem>>, vector<1x1x256xf32>
    %1 = vector.shape_cast %0 : vector<1x1x256xf32> to vector<1x256xf32>
    %c0_2 = arith.constant 0 : index
    %c0_3 = arith.constant 0 : index
    %2 = vector.load %arg2[%c0_2, %c0_3] : memref<256x1xf32, #tpu.memory_space<vmem>>, vector<256x1xf32>
    %3 = vector.broadcast %2 : vector<256x1xf32> to vector<256x256xf32>
    %4 = vector.broadcast %1 : vector<1x256xf32> to vector<256x256xf32>
    %5 = arith.mulf %3, %4 : vector<256x256xf32>
    %c0_4 = arith.constant 0 : index
    %c0_5 = arith.constant 0 : index
    %6 = vector.load %arg3[%c0_4, %c0_5] : memref<256x1xf32, #tpu.memory_space<vmem>>, vector<256x1xf32>
    %7 = vector.broadcast %6 : vector<256x1xf32> to vector<256x256xf32>
    %8 = arith.addf %5, %7 : vector<256x256xf32>
    %c0_6 = arith.constant 0 : index
    %c0_7 = arith.constant 0 : index
    %9 = vector.load %arg4[%c0_6, %c0_7] : memref<256x256xbf16, #tpu.memory_space<vmem>>, vector<256x256xbf16>
    %10 = arith.truncf %8 : vector<256x256xf32> to vector<256x256xbf16>
    %cst = arith.constant dense<0.000000e+00> : vector<256x256xf32>
    %11 = tpu.matmul %9, %10, %cst {dimension_numbers = #tpu.dot_dimension_numbers<[1], [0], [0], [1], [0, 0, 1, 1], [], []>} : vector<256x256xbf16>, vector<256x256xbf16>, vector<256x256xf32> -> vector<256x256xf32>
    %c0_8 = arith.constant 0 : index
    %c0_9 = arith.constant 0 : index
    %12 = vector.load %arg5[%c0_8, %c0_9] : memref<256x1xf32, #tpu.memory_space<vmem>>, vector<256x1xf32>
    %13 = vector.broadcast %12 : vector<256x1xf32> to vector<256x256xf32>
    %14 = arith.addf %11, %13 : vector<256x256xf32>
    %c0_10 = arith.constant 0 : index
    %c0_11 = arith.constant 0 : index
    %15 = vector.load %arg6[%c0_10, %c0_11] : memref<256x256xbf16, #tpu.memory_space<vmem>>, vector<256x256xbf16>
    %16 = arith.truncf %14 : vector<256x256xf32> to vector<256x256xbf16>
    %cst_12 = arith.constant dense<0.000000e+00> : vector<256x256xf32>
    %17 = tpu.matmul %15, %16, %cst_12 {dimension_numbers = #tpu.dot_dimension_numbers<[1], [0], [0], [1], [0, 0, 1, 1], [], []>} : vector<256x256xbf16>, vector<256x256xbf16>, vector<256x256xf32> -> vector<256x256xf32>
    %c0_13 = arith.constant 0 : index
    %c0_14 = arith.constant 0 : index
    %18 = vector.load %arg7[%c0_13, %c0_14] : memref<256x1xf32, #tpu.memory_space<vmem>>, vector<256x1xf32>
    %19 = vector.broadcast %18 : vector<256x1xf32> to vector<256x256xf32>
    %20 = arith.addf %17, %19 : vector<256x256xf32>
    %c0_15 = arith.constant 0 : index
    %c0_16 = arith.constant 0 : index
    %21 = vector.load %arg8[%c0_15, %c0_16] : memref<4x256xbf16, #tpu.memory_space<vmem>>, vector<4x256xbf16>
    %22 = arith.truncf %20 : vector<256x256xf32> to vector<256x256xbf16>
    %cst_17 = arith.constant dense<0.000000e+00> : vector<4x256xf32>
    %23 = tpu.matmul %21, %22, %cst_17 {dimension_numbers = #tpu.dot_dimension_numbers<[1], [0], [0], [1], [0, 0, 1, 1], [], []>} : vector<4x256xbf16>, vector<256x256xbf16>, vector<4x256xf32> -> vector<4x256xf32>
    %24 = arith.truncf %23 : vector<4x256xf32> to vector<4x256xbf16>
    %c0_18 = arith.constant 0 : index
    %c0_19 = arith.constant 0 : index
    %c0_20 = arith.constant 0 : index
    %25 = vector.load %arg10[%c0_18, %c0_19, %c0_20] : memref<2x24x256xbf16, #tpu.memory_space<vmem>>, vector<1x24x256xbf16>
    %26 = vector.shape_cast %25 : vector<1x24x256xbf16> to vector<24x256xbf16>
    %c1 = arith.constant 1 : index
    %c0_21 = arith.constant 0 : index
    %c0_22 = arith.constant 0 : index
    %27 = vector.load %arg10[%c1, %c0_21, %c0_22] : memref<2x24x256xbf16, #tpu.memory_space<vmem>>, vector<1x24x256xbf16>
    %28 = vector.shape_cast %27 : vector<1x24x256xbf16> to vector<24x256xbf16>
    %29 = vector.extract_strided_slice %24 {offsets = [0, 0], sizes = [1, 256], strides = [1, 1]} : vector<4x256xbf16> to vector<1x256xbf16>
    %30 = vector.broadcast %29 : vector<1x256xbf16> to vector<24x256xbf16>
    %31 = arith.mulf %26, %30 : vector<24x256xbf16>
    %32 = vector.extract_strided_slice %24 {offsets = [2, 0], sizes = [1, 256], strides = [1, 1]} : vector<4x256xbf16> to vector<1x256xbf16>
    %33 = vector.broadcast %32 : vector<1x256xbf16> to vector<24x256xbf16>
    %34 = arith.mulf %28, %33 : vector<24x256xbf16>
    %35 = arith.addf %31, %34 : vector<24x256xbf16>
    %36 = vector.extract_strided_slice %24 {offsets = [1, 0], sizes = [1, 256], strides = [1, 1]} : vector<4x256xbf16> to vector<1x256xbf16>
    %37 = vector.broadcast %36 : vector<1x256xbf16> to vector<24x256xbf16>
    %38 = arith.mulf %26, %37 : vector<24x256xbf16>
    %39 = vector.extract_strided_slice %24 {offsets = [3, 0], sizes = [1, 256], strides = [1, 1]} : vector<4x256xbf16> to vector<1x256xbf16>
    %40 = vector.broadcast %39 : vector<1x256xbf16> to vector<24x256xbf16>
    %41 = arith.mulf %28, %40 : vector<24x256xbf16>
    %42 = arith.addf %38, %41 : vector<24x256xbf16>
    %43 = tpu.concatenate %35, %42 in 1 : vector<24x256xbf16>, vector<24x256xbf16> -> vector<24x512xbf16>
    %c0_23 = arith.constant 0 : index
    %c0_24 = arith.constant 0 : index
    %44 = vector.load %arg11[%c0_23, %c0_24] : memref<512x128xbf16, #tpu.memory_space<vmem>>, vector<512x128xbf16>
    %cst_25 = arith.constant dense<0.000000e+00> : vector<24x128xf32>
    %45 = tpu.matmul %43, %44, %cst_25 {dimension_numbers = #tpu.dot_dimension_numbers<[1], [0], [0], [1], [0, 0, 1, 1], [], []>} : vector<24x512xbf16>, vector<512x128xbf16>, vector<24x128xf32> -> vector<24x128xf32>
    %c0_26 = arith.constant 0 : index
    %c0_27 = arith.constant 0 : index
    %46 = vector.load %arg9[%c0_26, %c0_27] : memref<1x128xf32, #tpu.memory_space<vmem>>, vector<1x128xf32>
    %47 = vector.broadcast %46 : vector<1x128xf32> to vector<24x128xf32>
    %48 = arith.addf %45, %47 : vector<24x128xf32>
    %c0_28 = arith.constant 0 : index
    %c0_29 = arith.constant 0 : index
    %c0_30 = arith.constant 0 : index
    %49 = vector.load %arg12[%c0_28, %c0_29, %c0_30] : memref<1x24x128xf32, #tpu.memory_space<vmem>>, vector<1x24x128xf32>
    %50 = vector.shape_cast %49 : vector<1x24x128xf32> to vector<24x128xf32>
    %51 = vector.shape_cast %48 : vector<24x128xf32> to vector<1x24x128xf32>
    tpu.vector_store %arg12[%c0_28, %c0_29, %c0_30], %51 {strides = array<i32>} : memref<1x24x128xf32, #tpu.memory_space<vmem>>, vector<1x24x128xf32>,
    return
  }
  func.func @transform_0(%arg0: i32) -> (i32, i32, i32) {
    %c0_i32 = arith.constant 0 : i32
    %c0_i32_0 = arith.constant 0 : i32
    %c0_i32_1 = arith.constant 0 : i32
    return %arg0, %c0_i32, %c0_i32_0 : i32, i32, i32
  }
  func.func @transform_1(%arg0: i32) -> (i32, i32) {
    %c0_i32 = arith.constant 0 : i32
    %c0_i32_0 = arith.constant 0 : i32
    %c0_i32_1 = arith.constant 0 : i32
    return %c0_i32, %c0_i32_0 : i32, i32
  }
  func.func @transform_2(%arg0: i32) -> (i32, i32) {
    %c0_i32 = arith.constant 0 : i32
    %c0_i32_0 = arith.constant 0 : i32
    %c0_i32_1 = arith.constant 0 : i32
    return %c0_i32, %c0_i32_0 : i32, i32
  }
  func.func @transform_3(%arg0: i32) -> (i32, i32) {
    %c0_i32 = arith.constant 0 : i32
    %c0_i32_0 = arith.constant 0 : i32
    %c0_i32_1 = arith.constant 0 : i32
    return %c0_i32, %c0_i32_0 : i32, i32
  }
  func.func @transform_4(%arg0: i32) -> (i32, i32) {
    %c0_i32 = arith.constant 0 : i32
    %c0_i32_0 = arith.constant 0 : i32
    %c0_i32_1 = arith.constant 0 : i32
    return %c0_i32, %c0_i32_0 : i32, i32
  }
  func.func @transform_5(%arg0: i32) -> (i32, i32) {
    %c0_i32 = arith.constant 0 : i32
    %c0_i32_0 = arith.constant 0 : i32
    %c0_i32_1 = arith.constant 0 : i32
    return %c0_i32, %c0_i32_0 : i32, i32
  }
  func.func @transform_6(%arg0: i32) -> (i32, i32) {
    %c0_i32 = arith.constant 0 : i32
    %c0_i32_0 = arith.constant 0 : i32
    %c0_i32_1 = arith.constant 0 : i32
    return %c0_i32, %c0_i32_0 : i32, i32
  }
  func.func @transform_7(%arg0: i32) -> (i32, i32) {
    %c0_i32 = arith.constant 0 : i32
    %c0_i32_0 = arith.constant 0 : i32
    %c0_i32_1 = arith.constant 0 : i32
    return %c0_i32, %c0_i32_0 : i32, i32
  }
  func.func @transform_8(%arg0: i32) -> (i32, i32) {
    %c0_i32 = arith.constant 0 : i32
    %c0_i32_0 = arith.constant 0 : i32
    %c0_i32_1 = arith.constant 0 : i32
    return %c0_i32, %c0_i32_0 : i32, i32
  }
  func.func @transform_9(%arg0: i32) -> (i32, i32, i32) {
    %c0_i32 = arith.constant 0 : i32
    %c0_i32_0 = arith.constant 0 : i32
    %c0_i32_1 = arith.constant 0 : i32
    %c0_i32_2 = arith.constant 0 : i32
    return %c0_i32, %c0_i32_0, %c0_i32_1 : i32, i32, i32
  }
  func.func @transform_10(%arg0: i32) -> (i32, i32) {
    %c0_i32 = arith.constant 0 : i32
    %c0_i32_0 = arith.constant 0 : i32
    %c0_i32_1 = arith.constant 0 : i32
    return %c0_i32, %c0_i32_0 : i32, i32
  }
  func.func @transform_11(%arg0: i32) -> (i32, i32, i32) {
    %c0_i32 = arith.constant 0 : i32
    %c0_i32_0 = arith.constant 0 : i32
    %c0_i32_1 = arith.constant 0 : i32
    return %arg0, %c0_i32, %c0_i32_0 : i32, i32, i32
  }
}

</mosaic_0001>

<bundles_post_ra>
// kernel: model_forward.1
= control target key start
LH: loop header
LB: loop body
LE: loop exit
PB: predicated region body
PF: predicated region fallthrough
CT: control target
= control target key end

     0   :  { %s3161_s17 = smov 0   ;;  %s4446_s0 = inlined_call_operand.vmem [shape: f32[2,1,256], index: 0, kind: input, shape index: {}]   ;;  %s4447_s1 = inlined_call_operand.vmem [shape: f32[256,1], index: 1, kind: input, shape index: {}]   ;;  %s4448_s2 = inlined_call_operand.vmem [shape: f32[256,1], index: 2, kind: input, shape index: {}]   ;;  %s4449_s3 = inlined_call_operand.vmem [shape: bf16[256,256], index: 3, kind: input, shape index: {}]   ;;  %s4450_s4 = inlined_call_operand.vmem [shape: f32[256,1], index: 4, kind: input, shape index: {}]   ;;  %s4451_s5 = inlined_call_operand.vmem [shape: bf16[256,256], index: 5, kind: input, shape index: {}]   ;;  %s4452_s6 = inlined_call_operand.vmem [shape: f32[256,1], index: 6, kind: input, shape index: {}]   ;;  %s4453_s7 = inlined_call_operand.vmem [shape: bf16[4,256], index: 7, kind: input, shape index: {}]   ;;  %s4454_s8 = inlined_call_operand.vmem [shape: f32[1,128], index: 8, kind: input, shape index: {}]   ;;  %s4455_s9 = inlined_call_operand.vmem [shape: bf16[2,24,256], index: 9, kind: input, shape index: {}]   ;;  %s4456_s10 = inlined_call_operand.vmem [shape: bf16[512,128], index: 10, kind: input, shape index: {}]   ;;  %s4457_s11 = inlined_call_operand.vmem [shape: f32[2,24,128], index: 11, kind: output, shape index: {}]  }
   0x1 LB: > { %s2758_s18 = sadd.s32 4294967295, %s3098_s17   ;;  %p2762_p0 = scmp.ge.s32.totalorder %s3098_s17, 1  ;;  %s3098_s17 = sphi %s3161_s17, %s21_s17  }
   0x2   : > { %p336_p1 = scmp.lt.s32.totalorder %s3098_s17, 3 }
   0x4   : > { %p337_p2 = pnand %p2762_p0, %p336_p1 }
   0x6   : > { %340 = sbr.rel (%p337_p2) target bundleno = 1421 (0x58d), region = 64 }
   0xb   : > { %v667_v0 = vld [vmem:[%s4448_s2 + $0x70] sm:$0xff]  ;;  %v3100_v2 = vmov 0   ;;  %v668_v3 = vld [vmem:[%s4448_s2 + $0x78] sm:$0xff]  ;;  %v399_v5 = vld [vmem:[%s4447_s1 + $0x68] sm:$0xff]  ;;  %p375_p3 = scmp.lt.s32.totalorder %s2758_s18, 1  ;;  %v579_v59 = vlaneseq }
   0xc   : > { %v400_v1 = vld [vmem:[%s4447_s1 + $0x70] sm:$0xff]  ;;  %2963 = vset.pattern.permute.xlu1 %v3100_v2  ;;  %2962 = vset.pattern.permute.xlu0 %v3100_v2  ;;  %v401_v4 = vld [vmem:[%s4447_s1 + $0x78] sm:$0xff]  ;;  %v398_v6 = vld [vmem:[%s4447_s1 + $0x60] sm:$0xff] }
   0xd   : > { %757 = vperm.xlu1 %2963, %v667_v0   ;;  %490 = vperm.xlu0 %2962, %v400_v1   ;;  %v666_v7 = vld [vmem:[%s4448_s2 + $0x68] sm:$0xff]  ;;  %v665_v8 = vld [vmem:[%s4448_s2 + $0x60] sm:$0xff]  ;;  %v397_v9 = vld [vmem:[%s4447_s1 + $0x58] sm:$0xff]  ;;  %s4526_s18 = smov (!%p375_p3, %s2758_s18), 1  ;;  %v580_v62 = vshrl.u32 %v579_v59, 7 }
   0xe   : > { %v396_v10 = vld [vmem:[%s4447_s1 + $0x50] sm:$0xff]  ;;  %v664_v11 = vld [vmem:[%s4448_s2 + $0x58] sm:$0xff]  ;;  %v395_v13 = vld [vmem:[%s4447_s1 + $0x48] sm:$0xff]  ;;  %s2763_s20 = sshll.u32 %s4526_s18, 1  ;;  %s2952_s28 = smul.u32 24, %s4526_s18 }
   0xf   : > { %v663_v12 = vld [vmem:[%s4448_s2 + $0x50] sm:$0xff]  ;;  %v394_v14 = vld [vmem:[%s4447_s1 + $0x40] sm:$0xff]  ;;  %v662_v15 = vld [vmem:[%s4448_s2 + $0x48] sm:$0xff]  ;;  %s378_s27 = scalar_lea.vmem %s4446_s0, %s2763_s20  ;;  %v3365_v1 = vsub.s32 0, %v580_v62  ;;  %v3367_v2 = vsub.s32 1, %v580_v62 }
  0x10   : > { %v661_v16 = vld [vmem:[%s4448_s2 + $0x40] sm:$0xff]  ;;  %v393_v17 = vld [vmem:[%s4447_s1 + $0x38] sm:$0xff]  ;;  %v392_v18 = vld [vmem:[%s4447_s1 + $0x30] sm:$0xff]  ;;  %s383_s12 = scalar_lea.vmem %s4457_s11, %s2952_s28 }
  0x11   : > { %762 = vperm.xlu1 %2963, %v668_v3   ;;  %495 = vperm.xlu0 %2962, %v401_v4   ;;  %v660_v19 = vld [vmem:[%s4448_s2 + $0x38] sm:$0xff]  ;;  %v659_v20 = vld [vmem:[%s4448_s2 + $0x30] sm:$0xff]  ;;  %v391_v21 = vld [vmem:[%s4447_s1 + $0x28] sm:$0xff]  ;;  %4479 = vst [vmem:[#allocation2_spill] sm:$0xff] %v3365_v1 }
  0x12   : > { %v390_v22 = vld [vmem:[%s4447_s1 + $0x20] sm:$0xff]  ;;  %v658_v23 = vld [vmem:[%s4448_s2 + $0x28] sm:$0xff]  ;;  %v389_v25 = vld [vmem:[%s4447_s1 + $0x18] sm:$0xff]  ;;  %4480 = vst [vmem:[#allocation3_spill] sm:$0xff] %v3367_v2 }
  0x13   : > { %v657_v24 = vld [vmem:[%s4448_s2 + $0x20] sm:$0xff]  ;;  %v388_v26 = vld [vmem:[%s4447_s1 + $0x10] sm:$0xff]  ;;  %v656_v27 = vld [vmem:[%s4448_s2 + $0x18] sm:$0xff] }
  0x14   : > { %v655_v28 = vld [vmem:[%s4448_s2 + $0x10] sm:$0xff]  ;;  %v387_v29 = vld [vmem:[%s4447_s1 + $0x8] sm:$0xff]  ;;  %v386_v30 = vld [vmem:[%s4447_s1] sm:$0xff] }
  0x15   : > { %485 = vperm.xlu1 %2963, %v399_v5   ;;  %480 = vperm.xlu0 %2962, %v398_v6   ;;  %v654_v31 = vld [vmem:[%s4448_s2 + $0x8] sm:$0xff]  ;;  %v653_v32 = vld [vmem:[%s4448_s2] sm:$0xff]  ;;  %v417_v33 = vld [vmem:[%s4447_s1 + $0xf8] sm:$0xff] }
  0x16   : > { %v416_v34 = vld [vmem:[%s4447_s1 + $0xf0] sm:$0xff]  ;;  %v684_v35 = vld [vmem:[%s4448_s2 + $0xf8] sm:$0xff]  ;;  %v415_v37 = vld [vmem:[%s4447_s1 + $0xe8] sm:$0xff] }
  0x17   : > { %v683_v36 = vld [vmem:[%s4448_s2 + $0xf0] sm:$0xff]  ;;  %v414_v38 = vld [vmem:[%s4447_s1 + $0xe0] sm:$0xff]  ;;  %v682_v39 = vld [vmem:[%s4448_s2 + $0xe8] sm:$0xff] }
  0x18   : > { %v681_v40 = vld [vmem:[%s4448_s2 + $0xe0] sm:$0xff]  ;;  %v413_v41 = vld [vmem:[%s4447_s1 + $0xd8] sm:$0xff]  ;;  %v412_v42 = vld [vmem:[%s4447_s1 + $0xd0] sm:$0xff] }
  0x19   : > { %752 = vperm.xlu1 %2963, %v666_v7   ;;  %747 = vperm.xlu0 %2962, %v665_v8   ;;  %v680_v43 = vld [vmem:[%s4448_s2 + $0xd8] sm:$0xff]  ;;  %v679_v44 = vld [vmem:[%s4448_s2 + $0xd0] sm:$0xff]  ;;  %v411_v45 = vld [vmem:[%s4447_s1 + $0xc8] sm:$0xff] }
  0x1a   : > { %v410_v46 = vld [vmem:[%s4447_s1 + $0xc0] sm:$0xff]  ;;  %v678_v47 = vld [vmem:[%s4448_s2 + $0xc8] sm:$0xff]  ;;  %v409_v49 = vld [vmem:[%s4447_s1 + $0xb8] sm:$0xff] }
  0x1b   : > { %v677_v48 = vld [vmem:[%s4448_s2 + $0xc0] sm:$0xff]  ;;  %v408_v50 = vld [vmem:[%s4447_s1 + $0xb0] sm:$0xff]  ;;  %v676_v51 = vld [vmem:[%s4448_s2 + $0xb8] sm:$0xff] }
  0x1c   : > { %v675_v52 = vld [vmem:[%s4448_s2 + $0xb0] sm:$0xff]  ;;  %v407_v53 = vld [vmem:[%s4447_s1 + $0xa8] sm:$0xff]  ;;  %v406_v54 = vld [vmem:[%s4447_s1 + $0xa0] sm:$0xff] }
  0x1d   : > { %475 = vperm.xlu1 %2963, %v397_v9   ;;  %470 = vperm.xlu0 %2962, %v396_v10   ;;  %v674_v55 = vld [vmem:[%s4448_s2 + $0xa8] sm:$0xff]  ;;  %v673_v56 = vld [vmem:[%s4448_s2 + $0xa0] sm:$0xff]  ;;  %v405_v57 = vld [vmem:[%s4447_s1 + $0x98] sm:$0xff] }
  0x1e   : > { %v404_v58 = vld [vmem:[%s4447_s1 + $0x90] sm:$0xff]  ;;  %v672_v60 = vld [vmem:[%s4448_s2 + $0x98] sm:$0xff]  ;;  %v403_v63 = vld [vmem:[%s4447_s1 + $0x88] sm:$0xff] }
  0x1f   : > { %v671_v61 = vld [vmem:[%s4448_s2 + $0x90] sm:$0xff]  ;;  %v402_v0 = vld [vmem:[%s4447_s1 + $0x80] sm:$0xff]  ;;  %v670_v4 = vld [vmem:[%s4448_s2 + $0x88] sm:$0xff] }
  0x20   : > { %v385_v3 = vld [vmem:[%s378_s27] sm:$0x3]  ;;  %v988_v10 = vld [vmem:[%s4450_s4 + $0x78] sm:$0xff]  ;;  %v978_v59 = vld [vmem:[%s4450_s4 + $0x28] sm:$0xff] }
  0x21   : > { %742 = vperm.xlu1 %2963, %v664_v11   ;;  %737 = vperm.xlu0 %2962, %v663_v12   ;;  %v669_v5 = vld [vmem:[%s4448_s2 + $0x80] sm:$0xff]  ;;  %v3376_v8 = vrot.slane %v385_v3, %v3365_v1  ;;  %v3379_v9 = vrot.slane %v385_v3, %v3367_v2  ;;  %v987_v11 = vld [vmem:[%s4450_s4 + $0x70] sm:$0xff] }
  0x22   : > { %v2966_v12 = vld [vmem:[%s4449_s3 + $0x4] ss:$8 sps:$4 sm:$0xff]  }
  0x23   : > { %1357 = vmatprep.mubr.bf16.mxu0 %v2966_v12 }
  0x25   : > { %465 = vperm.xlu1 %2963, %v395_v13   ;;  %460 = vperm.xlu0 %2962, %v394_v14  }
  0x29   : > { %732 = vperm.xlu1 %2963, %v662_v15   ;;  %727 = vperm.xlu0 %2962, %v661_v16  }
  0x2d   : > { %455 = vperm.xlu1 %2963, %v393_v17   ;;  %450 = vperm.xlu0 %2962, %v392_v18  }
  0x31   : > { %722 = vperm.xlu1 %2963, %v660_v19   ;;  %717 = vperm.xlu0 %2962, %v659_v20   ;;  %v986_v19 = vld [vmem:[%s4450_s4 + $0x68] sm:$0xff]  ;;  %v985_v20 = vld [vmem:[%s4450_s4 + $0x60] sm:$0xff] }
  0x35   : > { %445 = vperm.xlu1 %2963, %v391_v21   ;;  %440 = vperm.xlu0 %2962, %v390_v22  }
  0x39   : > { %712 = vperm.xlu1 %2963, %v658_v23   ;;  %707 = vperm.xlu0 %2962, %v657_v24  }
  0x3d   : > { %435 = vperm.xlu1 %2963, %v389_v25   ;;  %430 = vperm.xlu0 %2962, %v388_v26  }
  0x41   : > { %702 = vperm.xlu1 %2963, %v656_v27   ;;  %697 = vperm.xlu0 %2962, %v655_v28  }
  0x45   : > { %425 = vperm.xlu1 %2963, %v387_v29   ;;  %420 = vperm.xlu0 %2962, %v386_v30  }
  0x49   : > { %692 = vperm.xlu1 %2963, %v654_v31   ;;  %687 = vperm.xlu0 %2962, %v653_v32  }
  0x4d   : > { %575 = vperm.xlu1 %2963, %v417_v33   ;;  %570 = vperm.xlu0 %2962, %v416_v34   ;;  %v984_v33 = vld [vmem:[%s4450_s4 + $0x58] sm:$0xff]  ;;  %v983_v34 = vld [vmem:[%s4450_s4 + $0x50] sm:$0xff] }
  0x51   : > { %842 = vperm.xlu1 %2963, %v684_v35   ;;  %837 = vperm.xlu0 %2962, %v683_v36  }
  0x55   : > { %565 = vperm.xlu1 %2963, %v415_v37   ;;  %560 = vperm.xlu0 %2962, %v414_v38  }
  0x59   : > { %832 = vperm.xlu1 %2963, %v682_v39   ;;  %827 = vperm.xlu0 %2962, %v681_v40  }
  0x5d   : > { %555 = vperm.xlu1 %2963, %v413_v41   ;;  %550 = vperm.xlu0 %2962, %v412_v42   ;;  %v982_v41 = vld [vmem:[%s4450_s4 + $0x48] sm:$0xff]  ;;  %v981_v42 = vld [vmem:[%s4450_s4 + $0x40] sm:$0xff] }
  0x61   : > { %822 = vperm.xlu1 %2963, %v680_v43   ;;  %817 = vperm.xlu0 %2962, %v679_v44  }
  0x65   : > { %545 = vperm.xlu1 %2963, %v411_v45   ;;  %540 = vperm.xlu0 %2962, %v410_v46  }
  0x69   : > { %812 = vperm.xlu1 %2963, %v678_v47   ;;  %807 = vperm.xlu0 %2962, %v677_v48  }
  0x6d   : > { %535 = vperm.xlu1 %2963, %v409_v49   ;;  %530 = vperm.xlu0 %2962, %v408_v50  }
  0x71   : > { %802 = vperm.xlu1 %2963, %v676_v51   ;;  %797 = vperm.xlu0 %2962, %v675_v52   ;;  %v980_v51 = vld [vmem:[%s4450_s4 + $0x38] sm:$0xff]  ;;  %v979_v52 = vld [vmem:[%s4450_s4 + $0x30] sm:$0xff] }
  0x75   : > { %525 = vperm.xlu1 %2963, %v407_v53   ;;  %520 = vperm.xlu0 %2962, %v406_v54  }
  0x79   : > { %792 = vperm.xlu1 %2963, %v674_v55   ;;  %787 = vperm.xlu0 %2962, %v673_v56  }
  0x7d   : > { %515 = vperm.xlu1 %2963, %v405_v57   ;;  %510 = vperm.xlu0 %2962, %v404_v58  }
  0x81   : > { %782 = vperm.xlu1 %2963, %v672_v60   ;;  %777 = vperm.xlu0 %2962, %v671_v61   ;;  %v977_v60 = vld [vmem:[%s4450_s4 + $0x20] sm:$0xff] }
  0x85   : > { %505 = vperm.xlu1 %2963, %v403_v63   ;;  %500 = vperm.xlu0 %2962, %v402_v0  }
  0x88   : > { %v758_v6 = vpop.permute.xlu1 %757  ;;  %v491_v7 = vpop.permute.xlu0 %490 }
  0x89   : > { %772 = vperm.xlu1 %2963, %v670_v4   ;;  %767 = vperm.xlu0 %2962, %v669_v5   ;;  %v617_v13 = vmul.f32 %v3376_v8, %v491_v7  ;;  %v618_v14 = vmul.f32 %v3379_v9, %v491_v7  ;;  %v976_v7 = vld [vmem:[%s4450_s4 + $0x18] sm:$0xff] }
  0x8b   : > { %v874_v25 = vadd.f32 %v758_v6, %v618_v14  ;;  %v873_v26 = vadd.f32 %v758_v6, %v617_v13 }
  0x8c   : > { %v763_v15 = vpop.permute.xlu1 %762  ;;  %v496_v16 = vpop.permute.xlu0 %495 }
  0x8d   : > { %v619_v17 = vmul.f32 %v3376_v8, %v496_v16  ;;  %v620_v18 = vmul.f32 %v3379_v9, %v496_v16  ;;  %1082 = vperm.xlu1 %2963, %v988_v10   ;;  %1077 = vperm.xlu0 %2962, %v987_v11   ;;  %v975_v10 = vld [vmem:[%s4450_s4 + $0x10] sm:$0xff] }
  0x8f   : > { %v876_v21 = vadd.f32 %v763_v15, %v620_v18  ;;  %v875_v22 = vadd.f32 %v763_v15, %v619_v17  ;;  %v974_v17 = vld [vmem:[%s4450_s4 + $0x8] sm:$0xff]  ;;  %v973_v18 = vld [vmem:[%s4450_s4] sm:$0xff] }
  0x90   : > { %v486_v23 = vpop.permute.xlu1 %485  ;;  %v481_v24 = vpop.permute.xlu0 %480 }
  0x91   : > { %1072 = vperm.xlu1 %2963, %v986_v19   ;;  %1067 = vperm.xlu0 %2962, %v985_v20   ;;  %v956_v27 = vpack.c.bf16 %v876_v21, %v874_v25  ;;  %v955_v28 = vpack.c.bf16 %v875_v22, %v873_v26  ;;  %v615_v29 = vmul.f32 %v3376_v8, %v486_v23 }
  0x92   : > { %v616_v30 = vmul.f32 %v3379_v9, %v486_v23  ;;  %v613_v31 = vmul.f32 %v3376_v8, %v481_v24  ;;  %v614_v32 = vmul.f32 %v3379_v9, %v481_v24 }
  0x93   : > { %1325 = vmatprep.subr.bf16.mxu0 %v956_v27  ;;  %v1004_v27 = vld [vmem:[%s4450_s4 + $0xf8] sm:$0xff] }
  0x94   : > { %v753_v35 = vpop.permute.xlu1 %752  ;;  %v748_v36 = vpop.permute.xlu0 %747  ;;  %1326 = vmatpush1.bf16.msra.mxu0 %v955_v28  ;;  %v1003_v28 = vld [vmem:[%s4450_s4 + $0xf0] sm:$0xff] }
  0x95   : > { %v871_v37 = vadd.f32 %v753_v35, %v615_v29  ;;  %v872_v38 = vadd.f32 %v753_v35, %v616_v30  ;;  %v869_v39 = vadd.f32 %v748_v36, %v613_v31  ;;  %v870_v40 = vadd.f32 %v748_v36, %v614_v32  ;;  %1062 = vperm.xlu1 %2963, %v984_v33   ;;  %v1002_v35 = vld [vmem:[%s4450_s4 + $0xe8] sm:$0xff]  ;;  %v1001_v36 = vld [vmem:[%s4450_s4 + $0xe0] sm:$0xff] }
  0x96   : > { %1057 = vperm.xlu0 %2962, %v983_v34  }
  0x97   : > { %v954_v43 = vpack.c.bf16 %v872_v38, %v870_v40  ;;  %v953_v44 = vpack.c.bf16 %v871_v37, %v869_v39 }
  0x98   : > { %v476_v45 = vpop.permute.xlu1 %475  ;;  %v471_v46 = vpop.permute.xlu0 %470 }
  0x99   : > { %1327 = vmatprep.subr.bf16.mxu0 %v954_v43  ;;  %1052 = vperm.xlu1 %2963, %v982_v41   ;;  %v611_v47 = vmul.f32 %v3376_v8, %v476_v45  ;;  %v612_v48 = vmul.f32 %v3379_v9, %v476_v45  ;;  %v609_v49 = vmul.f32 %v3376_v8, %v471_v46  ;;  %v1000_v45 = vld [vmem:[%s4450_s4 + $0xd8] sm:$0xff] }
  0x9a   : > { %1047 = vperm.xlu0 %2962, %v981_v42   ;;  %v610_v50 = vmul.f32 %v3379_v9, %v471_v46  ;;  %1328 = vmatpush1.bf16.msra.mxu0 %v953_v44  ;;  %v999_v46 = vld [vmem:[%s4450_s4 + $0xd0] sm:$0xff] }
  0x9c   : > { %v743_v53 = vpop.permute.xlu1 %742  ;;  %v738_v54 = vpop.permute.xlu0 %737 }
  0x9d   : > { %v867_v55 = vadd.f32 %v743_v53, %v611_v47  ;;  %v868_v56 = vadd.f32 %v743_v53, %v612_v48  ;;  %v865_v57 = vadd.f32 %v738_v54, %v609_v49  ;;  %v866_v58 = vadd.f32 %v738_v54, %v610_v50  ;;  %1042 = vperm.xlu1 %2963, %v980_v51   ;;  %v998_v53 = vld [vmem:[%s4450_s4 + $0xc8] sm:$0xff]  ;;  %v997_v54 = vld [vmem:[%s4450_s4 + $0xc0] sm:$0xff] }
  0x9e   : > { %1037 = vperm.xlu0 %2962, %v979_v52  }
  0x9f   : > { %v952_v61 = vpack.c.bf16 %v868_v56, %v866_v58  ;;  %v951_v62 = vpack.c.bf16 %v867_v55, %v865_v57 }
  0xa0   : > { %v466_v63 = vpop.permute.xlu1 %465  ;;  %v461_v0 = vpop.permute.xlu0 %460 }
  0xa1   : > { %1329 = vmatprep.subr.bf16.mxu0 %v952_v61  ;;  %1032 = vperm.xlu1 %2963, %v978_v59   ;;  %v607_v3 = vmul.f32 %v3376_v8, %v466_v63  ;;  %v608_v4 = vmul.f32 %v3379_v9, %v466_v63  ;;  %v605_v5 = vmul.f32 %v3376_v8, %v461_v0  ;;  %v996_v63 = vld [vmem:[%s4450_s4 + $0xb8] sm:$0xff] }
  0xa2   : > { %1027 = vperm.xlu0 %2962, %v977_v60   ;;  %v606_v6 = vmul.f32 %v3379_v9, %v461_v0  ;;  %1330 = vmatpush1.bf16.msra.mxu0 %v951_v62  ;;  %v995_v0 = vld [vmem:[%s4450_s4 + $0xb0] sm:$0xff] }
  0xa4   : > { %v733_v11 = vpop.permute.xlu1 %732  ;;  %v728_v12 = vpop.permute.xlu0 %727 }
  0xa5   : > { %v863_v13 = vadd.f32 %v733_v11, %v607_v3  ;;  %v864_v14 = vadd.f32 %v733_v11, %v608_v4  ;;  %v861_v15 = vadd.f32 %v728_v12, %v605_v5  ;;  %v862_v16 = vadd.f32 %v728_v12, %v606_v6  ;;  %1022 = vperm.xlu1 %2963, %v976_v7   ;;  %v994_v11 = vld [vmem:[%s4450_s4 + $0xa8] sm:$0xff]  ;;  %v993_v12 = vld [vmem:[%s4450_s4 + $0xa0] sm:$0xff] }
  0xa6   : > { %1017 = vperm.xlu0 %2962, %v975_v10  }
  0xa7   : > { %v950_v19 = vpack.c.bf16 %v864_v14, %v862_v16  ;;  %v949_v20 = vpack.c.bf16 %v863_v13, %v861_v15 }
  0xa8   : > { %v456_v21 = vpop.permute.xlu1 %455  ;;  %v451_v22 = vpop.permute.xlu0 %450 }
  0xa9   : > { %1331 = vmatprep.subr.bf16.mxu0 %v950_v19  ;;  %1012 = vperm.xlu1 %2963, %v974_v17   ;;  %v603_v23 = vmul.f32 %v3376_v8, %v456_v21  ;;  %v604_v24 = vmul.f32 %v3379_v9, %v456_v21  ;;  %v601_v25 = vmul.f32 %v3376_v8, %v451_v22  ;;  %v992_v21 = vld [vmem:[%s4450_s4 + $0x98] sm:$0xff] }
  0xaa   : > { %1007 = vperm.xlu0 %2962, %v973_v18   ;;  %v602_v26 = vmul.f32 %v3379_v9, %v451_v22  ;;  %1332 = vmatpush1.bf16.msra.mxu0 %v949_v20  ;;  %v991_v22 = vld [vmem:[%s4450_s4 + $0x90] sm:$0xff] }
  0xac   : > { %v723_v29 = vpop.permute.xlu1 %722  ;;  %v718_v30 = vpop.permute.xlu0 %717 }
  0xad   : > { %v859_v31 = vadd.f32 %v723_v29, %v603_v23  ;;  %v860_v32 = vadd.f32 %v723_v29, %v604_v24  ;;  %v857_v33 = vadd.f32 %v718_v30, %v601_v25  ;;  %v858_v34 = vadd.f32 %v718_v30, %v602_v26  ;;  %1162 = vperm.xlu1 %2963, %v1004_v27  }
  0xae   : > { %1157 = vperm.xlu0 %2962, %v1003_v28  }
  0xaf   : > { %v948_v37 = vpack.c.bf16 %v860_v32, %v858_v34  ;;  %v947_v38 = vpack.c.bf16 %v859_v31, %v857_v33  ;;  %v990_v31 = vld [vmem:[%s4450_s4 + $0x88] sm:$0xff]  ;;  %v989_v32 = vld [vmem:[%s4450_s4 + $0x80] sm:$0xff] }
  0xb0   : > { %v446_v39 = vpop.permute.xlu1 %445  ;;  %v441_v40 = vpop.permute.xlu0 %440 }
  0xb1   : > { %1333 = vmatprep.subr.bf16.mxu0 %v948_v37  ;;  %1152 = vperm.xlu1 %2963, %v1002_v35   ;;  %v599_v41 = vmul.f32 %v3376_v8, %v446_v39  ;;  %v600_v42 = vmul.f32 %v3379_v9, %v446_v39  ;;  %v597_v43 = vmul.f32 %v3376_v8, %v441_v40  ;;  %v1597_v39 = vld [vmem:[%s4452_s6 + $0x78] sm:$0xff] }
  0xb2   : > { %1147 = vperm.xlu0 %2962, %v1001_v36   ;;  %v598_v44 = vmul.f32 %v3379_v9, %v441_v40  ;;  %1334 = vmatpush1.bf16.msra.mxu0 %v947_v38  ;;  %v1596_v40 = vld [vmem:[%s4452_s6 + $0x70] sm:$0xff] }
  0xb4   : > { %v713_v47 = vpop.permute.xlu1 %712  ;;  %v708_v48 = vpop.permute.xlu0 %707 }
  0xb5   : > { %v855_v49 = vadd.f32 %v713_v47, %v599_v41  ;;  %v856_v50 = vadd.f32 %v713_v47, %v600_v42  ;;  %v853_v51 = vadd.f32 %v708_v48, %v597_v43  ;;  %v854_v52 = vadd.f32 %v708_v48, %v598_v44  ;;  %1142 = vperm.xlu1 %2963, %v1000_v45  }
  0xb6   : > { %1137 = vperm.xlu0 %2962, %v999_v46  }
  0xb7   : > { %v946_v55 = vpack.c.bf16 %v856_v50, %v854_v52  ;;  %v945_v56 = vpack.c.bf16 %v855_v49, %v853_v51  ;;  %v1595_v49 = vld [vmem:[%s4452_s6 + $0x68] sm:$0xff]  ;;  %v1594_v50 = vld [vmem:[%s4452_s6 + $0x60] sm:$0xff] }
  0xb8   : > { %v436_v57 = vpop.permute.xlu1 %435  ;;  %v431_v58 = vpop.permute.xlu0 %430 }
  0xb9   : > { %1335 = vmatprep.subr.bf16.mxu0 %v946_v55  ;;  %1132 = vperm.xlu1 %2963, %v998_v53   ;;  %v595_v59 = vmul.f32 %v3376_v8, %v436_v57  ;;  %v596_v60 = vmul.f32 %v3379_v9, %v436_v57  ;;  %v593_v61 = vmul.f32 %v3376_v8, %v431_v58  ;;  %v1593_v57 = vld [vmem:[%s4452_s6 + $0x58] sm:$0xff] }
  0xba   : > { %1127 = vperm.xlu0 %2962, %v997_v54   ;;  %v594_v62 = vmul.f32 %v3379_v9, %v431_v58  ;;  %1336 = vmatpush1.bf16.msra.mxu0 %v945_v56  ;;  %v1592_v58 = vld [vmem:[%s4452_s6 + $0x50] sm:$0xff] }
  0xbc   : > { %v703_v3 = vpop.permute.xlu1 %702  ;;  %v698_v4 = vpop.permute.xlu0 %697 }
  0xbd   : > { %v851_v5 = vadd.f32 %v703_v3, %v595_v59  ;;  %v852_v6 = vadd.f32 %v703_v3, %v596_v60  ;;  %v849_v7 = vadd.f32 %v698_v4, %v593_v61  ;;  %v850_v10 = vadd.f32 %v698_v4, %v594_v62  ;;  %1122 = vperm.xlu1 %2963, %v996_v63  }
  0xbe   : > { %1117 = vperm.xlu0 %2962, %v995_v0  }
  0xbf   : > { %v944_v13 = vpack.c.bf16 %v852_v6, %v850_v10  ;;  %v943_v14 = vpack.c.bf16 %v851_v5, %v849_v7  ;;  %v1591_v5 = vld [vmem:[%s4452_s6 + $0x48] sm:$0xff]  ;;  %v1590_v6 = vld [vmem:[%s4452_s6 + $0x40] sm:$0xff] }
  0xc0   : > { %v426_v15 = vpop.permute.xlu1 %425  ;;  %v421_v16 = vpop.permute.xlu0 %420 }
  0xc1   : > { %1337 = vmatprep.subr.bf16.mxu0 %v944_v13  ;;  %1112 = vperm.xlu1 %2963, %v994_v11   ;;  %v591_v17 = vmul.f32 %v3376_v8, %v426_v15  ;;  %v592_v18 = vmul.f32 %v3379_v9, %v426_v15  ;;  %v589_v19 = vmul.f32 %v3376_v8, %v421_v16  ;;  %v1589_v15 = vld [vmem:[%s4452_s6 + $0x38] sm:$0xff] }
  0xc2   : > { %1107 = vperm.xlu0 %2962, %v993_v12   ;;  %v590_v20 = vmul.f32 %v3379_v9, %v421_v16  ;;  %1338 = vmatpush1.bf16.msra.mxu0 %v943_v14  ;;  %v1588_v16 = vld [vmem:[%s4452_s6 + $0x30] sm:$0xff] }
  0xc4   : > { %v693_v23 = vpop.permute.xlu1 %692  ;;  %v688_v24 = vpop.permute.xlu0 %687 }
  0xc5   : > { %v847_v25 = vadd.f32 %v693_v23, %v591_v17  ;;  %v848_v26 = vadd.f32 %v693_v23, %v592_v18  ;;  %v845_v27 = vadd.f32 %v688_v24, %v589_v19  ;;  %v846_v28 = vadd.f32 %v688_v24, %v590_v20  ;;  %1102 = vperm.xlu1 %2963, %v992_v21  }
  0xc6   : > { %1097 = vperm.xlu0 %2962, %v991_v22  }
  0xc7   : > { %v941_v29 = vpack.c.bf16 %v847_v25, %v845_v27  ;;  %v942_v30 = vpack.c.bf16 %v848_v26, %v846_v28  ;;  %v1587_v25 = vld [vmem:[%s4452_s6 + $0x28] sm:$0xff]  ;;  %v1586_v26 = vld [vmem:[%s4452_s6 + $0x20] sm:$0xff] }
  0xc8   : > { %v576_v33 = vpop.permute.xlu1 %575  ;;  %v571_v34 = vpop.permute.xlu0 %570 }
  0xc9   : > { %1339 = vmatprep.subr.bf16.mxu0 %v942_v30  ;;  %1092 = vperm.xlu1 %2963, %v990_v31   ;;  %v651_v35 = vmul.f32 %v3376_v8, %v576_v33  ;;  %v652_v36 = vmul.f32 %v3379_v9, %v576_v33  ;;  %v649_v37 = vmul.f32 %v3376_v8, %v571_v34  ;;  %v1585_v33 = vld [vmem:[%s4452_s6 + $0x18] sm:$0xff] }
  0xca   : > { %1087 = vperm.xlu0 %2962, %v989_v32   ;;  %v650_v38 = vmul.f32 %v3379_v9, %v571_v34  ;;  %1340 = vmatpush1.bf16.msra.mxu0 %v941_v29  ;;  %v1584_v34 = vld [vmem:[%s4452_s6 + $0x10] sm:$0xff] }
  0xcc   : > { %v843_v41 = vpop.permute.xlu1 %842  ;;  %v838_v42 = vpop.permute.xlu0 %837 }
  0xcd   : > { %v907_v43 = vadd.f32 %v843_v41, %v651_v35  ;;  %v908_v44 = vadd.f32 %v843_v41, %v652_v36  ;;  %v905_v45 = vadd.f32 %v838_v42, %v649_v37  ;;  %v906_v46 = vadd.f32 %v838_v42, %v650_v38  ;;  %1691 = vperm.xlu1 %2963, %v1597_v39  }
  0xce   : > { %1686 = vperm.xlu0 %2962, %v1596_v40  }
  0xcf   : > { %v971_v47 = vpack.c.bf16 %v907_v43, %v905_v45  ;;  %v972_v48 = vpack.c.bf16 %v908_v44, %v906_v46  ;;  %v1583_v43 = vld [vmem:[%s4452_s6 + $0x8] sm:$0xff]  ;;  %v1582_v44 = vld [vmem:[%s4452_s6] sm:$0xff] }
  0xd0   : > { %v566_v51 = vpop.permute.xlu1 %565  ;;  %v561_v52 = vpop.permute.xlu0 %560 }
  0xd1   : > { %1341 = vmatprep.subr.bf16.mxu0 %v972_v48  ;;  %1681 = vperm.xlu1 %2963, %v1595_v49   ;;  %v647_v53 = vmul.f32 %v3376_v8, %v566_v51  ;;  %v648_v54 = vmul.f32 %v3379_v9, %v566_v51  ;;  %v645_v55 = vmul.f32 %v3376_v8, %v561_v52  ;;  %v1613_v51 = vld [vmem:[%s4452_s6 + $0xf8] sm:$0xff] }
  0xd2   : > { %1676 = vperm.xlu0 %2962, %v1594_v50   ;;  %v646_v56 = vmul.f32 %v3379_v9, %v561_v52  ;;  %1342 = vmatpush2.bf16.msra.mxu0 %v971_v47  ;;  %v1612_v52 = vld [vmem:[%s4452_s6 + $0xf0] sm:$0xff] }
  0xd4   : > { %v833_v59 = vpop.permute.xlu1 %832  ;;  %v828_v60 = vpop.permute.xlu0 %827 }
  0xd5   : > { %v903_v61 = vadd.f32 %v833_v59, %v647_v53  ;;  %v904_v62 = vadd.f32 %v833_v59, %v648_v54  ;;  %v901_v63 = vadd.f32 %v828_v60, %v645_v55  ;;  %v902_v0 = vadd.f32 %v828_v60, %v646_v56  ;;  %1671 = vperm.xlu1 %2963, %v1593_v57  }
  0xd6   : > { %1666 = vperm.xlu0 %2962, %v1592_v58  }
  0xd7   : > { %v969_v3 = vpack.c.bf16 %v903_v61, %v901_v63  ;;  %v970_v4 = vpack.c.bf16 %v904_v62, %v902_v0  ;;  %v1611_v61 = vld [vmem:[%s4452_s6 + $0xe8] sm:$0xff]  ;;  %v1610_v62 = vld [vmem:[%s4452_s6 + $0xe0] sm:$0xff] }
  0xd8   : > { %v556_v7 = vpop.permute.xlu1 %555  ;;  %v551_v10 = vpop.permute.xlu0 %550 }
  0xd9   : > { %1343 = vmatprep.subr.bf16.mxu0 %v970_v4  ;;  %1661 = vperm.xlu1 %2963, %v1591_v5   ;;  %v643_v11 = vmul.f32 %v3376_v8, %v556_v7  ;;  %v644_v12 = vmul.f32 %v3379_v9, %v556_v7  ;;  %v641_v13 = vmul.f32 %v3376_v8, %v551_v10  ;;  %v1609_v7 = vld [vmem:[%s4452_s6 + $0xd8] sm:$0xff] }
  0xda   : > { %1656 = vperm.xlu0 %2962, %v1590_v6   ;;  %v642_v14 = vmul.f32 %v3379_v9, %v551_v10  ;;  %1344 = vmatpush2.bf16.msra.mxu0 %v969_v3  ;;  %v1608_v10 = vld [vmem:[%s4452_s6 + $0xd0] sm:$0xff] }
  0xdc   : > { %v823_v17 = vpop.permute.xlu1 %822  ;;  %v818_v18 = vpop.permute.xlu0 %817 }
  0xdd   : > { %v899_v19 = vadd.f32 %v823_v17, %v643_v11  ;;  %v900_v20 = vadd.f32 %v823_v17, %v644_v12  ;;  %v897_v21 = vadd.f32 %v818_v18, %v641_v13  ;;  %v898_v22 = vadd.f32 %v818_v18, %v642_v14  ;;  %1651 = vperm.xlu1 %2963, %v1589_v15  }
  0xde   : > { %1646 = vperm.xlu0 %2962, %v1588_v16  }
  0xdf   : > { %v967_v23 = vpack.c.bf16 %v899_v19, %v897_v21  ;;  %v968_v24 = vpack.c.bf16 %v900_v20, %v898_v22  ;;  %v1607_v19 = vld [vmem:[%s4452_s6 + $0xc8] sm:$0xff]  ;;  %v1606_v20 = vld [vmem:[%s4452_s6 + $0xc0] sm:$0xff] }
  0xe0   : > { %v546_v27 = vpop.permute.xlu1 %545  ;;  %v541_v28 = vpop.permute.xlu0 %540 }
  0xe1   : > { %1345 = vmatprep.subr.bf16.mxu0 %v968_v24  ;;  %1641 = vperm.xlu1 %2963, %v1587_v25   ;;  %v639_v29 = vmul.f32 %v3376_v8, %v546_v27  ;;  %v640_v30 = vmul.f32 %v3379_v9, %v546_v27  ;;  %v637_v31 = vmul.f32 %v3376_v8, %v541_v28  ;;  %v1605_v27 = vld [vmem:[%s4452_s6 + $0xb8] sm:$0xff] }
  0xe2   : > { %1636 = vperm.xlu0 %2962, %v1586_v26   ;;  %v638_v32 = vmul.f32 %v3379_v9, %v541_v28  ;;  %1346 = vmatpush2.bf16.msra.mxu0 %v967_v23  ;;  %v1604_v28 = vld [vmem:[%s4452_s6 + $0xb0] sm:$0xff] }
  0xe4   : > { %v813_v35 = vpop.permute.xlu1 %812  ;;  %v808_v36 = vpop.permute.xlu0 %807 }
  0xe5   : > { %v895_v37 = vadd.f32 %v813_v35, %v639_v29  ;;  %v896_v38 = vadd.f32 %v813_v35, %v640_v30  ;;  %v893_v39 = vadd.f32 %v808_v36, %v637_v31  ;;  %v894_v40 = vadd.f32 %v808_v36, %v638_v32  ;;  %1631 = vperm.xlu1 %2963, %v1585_v33  }
  0xe6   : > { %1626 = vperm.xlu0 %2962, %v1584_v34  }
  0xe7   : > { %v965_v41 = vpack.c.bf16 %v895_v37, %v893_v39  ;;  %v966_v42 = vpack.c.bf16 %v896_v38, %v894_v40  ;;  %v1603_v37 = vld [vmem:[%s4452_s6 + $0xa8] sm:$0xff]  ;;  %v1602_v38 = vld [vmem:[%s4452_s6 + $0xa0] sm:$0xff] }
  0xe8   : > { %v536_v45 = vpop.permute.xlu1 %535  ;;  %v531_v46 = vpop.permute.xlu0 %530 }
  0xe9   : > { %1347 = vmatprep.subr.bf16.mxu0 %v966_v42  ;;  %1621 = vperm.xlu1 %2963, %v1583_v43   ;;  %v635_v47 = vmul.f32 %v3376_v8, %v536_v45  ;;  %v636_v48 = vmul.f32 %v3379_v9, %v536_v45  ;;  %v633_v49 = vmul.f32 %v3376_v8, %v531_v46  ;;  %v1601_v45 = vld [vmem:[%s4452_s6 + $0x98] sm:$0xff] }
  0xea   : > { %1616 = vperm.xlu0 %2962, %v1582_v44   ;;  %v634_v50 = vmul.f32 %v3379_v9, %v531_v46  ;;  %1348 = vmatpush2.bf16.msra.mxu0 %v965_v41  ;;  %v1600_v46 = vld [vmem:[%s4452_s6 + $0x90] sm:$0xff] }
  0xec   : > { %v803_v53 = vpop.permute.xlu1 %802  ;;  %v798_v54 = vpop.permute.xlu0 %797 }
  0xed   : > { %v891_v55 = vadd.f32 %v803_v53, %v635_v47  ;;  %v892_v56 = vadd.f32 %v803_v53, %v636_v48  ;;  %v889_v57 = vadd.f32 %v798_v54, %v633_v49  ;;  %v890_v58 = vadd.f32 %v798_v54, %v634_v50  ;;  %1771 = vperm.xlu1 %2963, %v1613_v51   ;;  %v1598_v54 = vld [vmem:[%s4452_s6 + $0x80] sm:$0xff] }
  0xee   : > { %1766 = vperm.xlu0 %2962, %v1612_v52  }
  0xef   : > { %v963_v59 = vpack.c.bf16 %v891_v55, %v889_v57  ;;  %v964_v60 = vpack.c.bf16 %v892_v56, %v890_v58  ;;  %v2964_v55 = vld [vmem:[%s4449_s3] ss:$8 sps:$4 sm:$0xff]   ;;  %v2967_v56 = vld [vmem:[%s4449_s3 + $0x14] ss:$8 sps:$4 sm:$0xff]   ;;  %v2969_v57 = vld [vmem:[%s4449_s3 + $0x10] ss:$8 sps:$4 sm:$0xff]  }
  0xf0   : > { %v526_v63 = vpop.permute.xlu1 %525  ;;  %v521_v0 = vpop.permute.xlu0 %520  ;;  %v2970_v58 = vld [vmem:[%s4449_s3 + $0x24] ss:$8 sps:$4 sm:$0xff]  }
  0xf1   : > { %1349 = vmatprep.subr.bf16.mxu0 %v964_v60  ;;  %1761 = vperm.xlu1 %2963, %v1611_v61   ;;  %v631_v3 = vmul.f32 %v3376_v8, %v526_v63  ;;  %v632_v4 = vmul.f32 %v3379_v9, %v526_v63  ;;  %v629_v5 = vmul.f32 %v3376_v8, %v521_v0  ;;  %v2973_v60 = vld [vmem:[%s4449_s3 + $0x34] ss:$8 sps:$4 sm:$0xff]   ;;  %v2975_v61 = vld [vmem:[%s4449_s3 + $0x30] ss:$8 sps:$4 sm:$0xff]   ;;  %v2978_v63 = vld [vmem:[%s4449_s3 + $0x40] ss:$8 sps:$4 sm:$0xff]  }
  0xf2   : > { %1756 = vperm.xlu0 %2962, %v1610_v62   ;;  %v630_v6 = vmul.f32 %v3379_v9, %v521_v0  ;;  %1350 = vmatpush2.bf16.msra.mxu0 %v963_v59  ;;  %v2972_v59 = vld [vmem:[%s4449_s3 + $0x20] ss:$8 sps:$4 sm:$0xff]   ;;  %v2976_v62 = vld [vmem:[%s4449_s3 + $0x44] ss:$8 sps:$4 sm:$0xff]   ;;  %v2979_v0 = vld [vmem:[%s4449_s3 + $0x54] ss:$8 sps:$4 sm:$0xff]  }
  0xf4   : > { %v793_v11 = vpop.permute.xlu1 %792  ;;  %v788_v12 = vpop.permute.xlu0 %787 }
  0xf5   : > { %v887_v13 = vadd.f32 %v793_v11, %v631_v3  ;;  %v888_v14 = vadd.f32 %v793_v11, %v632_v4  ;;  %v885_v15 = vadd.f32 %v788_v12, %v629_v5  ;;  %v886_v16 = vadd.f32 %v788_v12, %v630_v6  ;;  %1751 = vperm.xlu1 %2963, %v1609_v7   ;;  %v2981_v3 = vld [vmem:[%s4449_s3 + $0x50] ss:$8 sps:$4 sm:$0xff]   ;;  %v2982_v4 = vld [vmem:[%s4449_s3 + $0x64] ss:$8 sps:$4 sm:$0xff]   ;;  %v2984_v5 = vld [vmem:[%s4449_s3 + $0x60] ss:$8 sps:$4 sm:$0xff]  }
  0xf6   : > { %1746 = vperm.xlu0 %2962, %v1608_v10   ;;  %v2985_v6 = vld [vmem:[%s4449_s3 + $0x74] ss:$8 sps:$4 sm:$0xff]   ;;  %v2987_v7 = vld [vmem:[%s4449_s3 + $0x70] ss:$8 sps:$4 sm:$0xff]   ;;  %v2988_v10 = vld [vmem:[%s4449_s3 + $0x84] ss:$8 sps:$4 sm:$0xff]  }
  0xf7   : > { %v961_v17 = vpack.c.bf16 %v887_v13, %v885_v15  ;;  %v962_v18 = vpack.c.bf16 %v888_v14, %v886_v16  ;;  %v2990_v11 = vld [vmem:[%s4449_s3 + $0x80] ss:$8 sps:$4 sm:$0xff]   ;;  %v2991_v12 = vld [vmem:[%s4449_s3 + $0x94] ss:$8 sps:$4 sm:$0xff]   ;;  %v2993_v13 = vld [vmem:[%s4449_s3 + $0x90] ss:$8 sps:$4 sm:$0xff]  }
  0xf8   : > { %v516_v21 = vpop.permute.xlu1 %515  ;;  %v511_v22 = vpop.permute.xlu0 %510  ;;  %v2994_v14 = vld [vmem:[%s4449_s3 + $0xa4] ss:$8 sps:$4 sm:$0xff]   ;;  %v2996_v15 = vld [vmem:[%s4449_s3 + $0xa0] ss:$8 sps:$4 sm:$0xff]   ;;  %v2997_v16 = vld [vmem:[%s4449_s3 + $0xb4] ss:$8 sps:$4 sm:$0xff]  }
  0xf9   : > { %1351 = vmatprep.subr.bf16.mxu0 %v962_v18  ;;  %1741 = vperm.xlu1 %2963, %v1607_v19   ;;  %v627_v23 = vmul.f32 %v3376_v8, %v516_v21  ;;  %v628_v24 = vmul.f32 %v3379_v9, %v516_v21  ;;  %v625_v25 = vmul.f32 %v3376_v8, %v511_v22  ;;  %v3000_v18 = vld [vmem:[%s4449_s3 + $0xc4] ss:$8 sps:$4 sm:$0xff]   ;;  %v3002_v19 = vld [vmem:[%s4449_s3 + $0xc0] ss:$8 sps:$4 sm:$0xff]   ;;  %v3005_v21 = vld [vmem:[%s4449_s3 + $0xd0] ss:$8 sps:$4 sm:$0xff]  }
  0xfa   : > { %1736 = vperm.xlu0 %2962, %v1606_v20   ;;  %v626_v26 = vmul.f32 %v3379_v9, %v511_v22  ;;  %1352 = vmatpush2.bf16.msra.mxu0 %v961_v17  ;;  %v2999_v17 = vld [vmem:[%s4449_s3 + $0xb0] ss:$8 sps:$4 sm:$0xff]   ;;  %v3003_v20 = vld [vmem:[%s4449_s3 + $0xd4] ss:$8 sps:$4 sm:$0xff]   ;;  %v3006_v22 = vld [vmem:[%s4449_s3 + $0xe4] ss:$8 sps:$4 sm:$0xff]  }
  0xfc   : > { %v783_v29 = vpop.permute.xlu1 %782  ;;  %v778_v30 = vpop.permute.xlu0 %777 }
  0xfd   : > { %v883_v31 = vadd.f32 %v783_v29, %v627_v23  ;;  %v884_v32 = vadd.f32 %v783_v29, %v628_v24  ;;  %v881_v33 = vadd.f32 %v778_v30, %v625_v25  ;;  %v882_v34 = vadd.f32 %v778_v30, %v626_v26  ;;  %1731 = vperm.xlu1 %2963, %v1605_v27   ;;  %v3008_v23 = vld [vmem:[%s4449_s3 + $0xe0] ss:$8 sps:$4 sm:$0xff]   ;;  %v3009_v24 = vld [vmem:[%s4449_s3 + $0xf4] ss:$8 sps:$4 sm:$0xff]   ;;  %v3011_v25 = vld [vmem:[%s4449_s3 + $0xf0] ss:$8 sps:$4 sm:$0xff]  }
  0xfe   : > { %1726 = vperm.xlu0 %2962, %v1604_v28  }
  0xff   : > { %v959_v35 = vpack.c.bf16 %v883_v31, %v881_v33  ;;  %v960_v36 = vpack.c.bf16 %v884_v32, %v882_v34 }
 0x100   : > { %v506_v39 = vpop.permute.xlu1 %505  ;;  %v501_v40 = vpop.permute.xlu0 %500 }
 0x101   : > { %1353 = vmatprep.subr.bf16.mxu0 %v960_v36  ;;  %1721 = vperm.xlu1 %2963, %v1603_v37   ;;  %v623_v41 = vmul.f32 %v3376_v8, %v506_v39  ;;  %v624_v42 = vmul.f32 %v3379_v9, %v506_v39  ;;  %v621_v43 = vmul.f32 %v3376_v8, %v501_v40 }
 0x102   : > { %1716 = vperm.xlu0 %2962, %v1602_v38   ;;  %v622_v44 = vmul.f32 %v3379_v9, %v501_v40  ;;  %1354 = vmatpush2.bf16.msra.mxu0 %v959_v35  ;;  %v1599_v9 = vld [vmem:[%s4452_s6 + $0x88] sm:$0xff] }
 0x104   : > { %v773_v47 = vpop.permute.xlu1 %772  ;;  %v768_v48 = vpop.permute.xlu0 %767 }
 0x105   : > { %v879_v49 = vadd.f32 %v773_v47, %v623_v41  ;;  %v880_v50 = vadd.f32 %v773_v47, %v624_v42  ;;  %v877_v51 = vadd.f32 %v768_v48, %v621_v43  ;;  %v878_v52 = vadd.f32 %v768_v48, %v622_v44  ;;  %1711 = vperm.xlu1 %2963, %v1601_v45  }
 0x106   : > { %1706 = vperm.xlu0 %2962, %v1600_v46  }
 0x107   : > { %v957_v8 = vpack.c.bf16 %v879_v49, %v877_v51  ;;  %v958_v53 = vpack.c.bf16 %v880_v50, %v878_v52 }
 0x108   : > { %v3733_v26 = vpop.permute.xlu1 %1082  ;;  %v3735_v27 = vpop.permute.xlu0 %1077 }
 0x109   : > { %1355 = vmatprep.subr.bf16.mxu0 %v958_v53  ;;  %1701 = vperm.xlu1 %2963, %v1599_v9  }
 0x10a   : > { %1696 = vperm.xlu0 %2962, %v1598_v54   ;;  %1356 = vmatpush2.bf16.msra.mxu0 %v957_v8 }
 0x10c   : > { %v3737_v28 = vpop.permute.xlu1 %1072  ;;  %v3739_v29 = vpop.permute.xlu0 %1067 }
 0x10d   : > { %1358 = vmatmul.mubr.bf16.vlgmr.msra.gmra.mxu0 %v2964_v55 }
 0x10e   : > { %1367 = vmatprep.mubr.bf16.mxu0 %v2967_v56 }
 0x110   : > { %v3741_v30 = vpop.permute.xlu1 %1062 }
 0x111   : > { %v3743_v31 = vpop.permute.xlu0 %1057 }
 0x114   : > { %v3745_v32 = vpop.permute.xlu1 %1052 }
 0x115   : > { %1368 = vmatmul.mubr.bf16.gmra.mxu0 %v2969_v57  ;;  %v3747_v33 = vpop.permute.xlu0 %1047 }
 0x116   : > { %1377 = vmatprep.mubr.bf16.mxu0 %v2970_v58 }
 0x118   : > { %v3749_v34 = vpop.permute.xlu1 %1042 }
 0x119   : > { %v3751_v35 = vpop.permute.xlu0 %1037 }
 0x11c   : > { %v3753_v36 = vpop.permute.xlu1 %1032 }
 0x11d   : > { %1378 = vmatmul.mubr.bf16.gmra.mxu0 %v2972_v59  ;;  %v3755_v37 = vpop.permute.xlu0 %1027 }
 0x11e   : > { %1387 = vmatprep.mubr.bf16.mxu0 %v2973_v60 }
 0x120   : > { %v1023_v38 = vpop.permute.xlu1 %1022 }
 0x121   : > { %v1018_v39 = vpop.permute.xlu0 %1017 }
 0x124   : > { %v1013_v42 = vpop.permute.xlu1 %1012 }
 0x125   : > { %1388 = vmatmul.mubr.bf16.gmra.mxu0 %v2975_v61  ;;  %v1008_v43 = vpop.permute.xlu0 %1007 }
 0x126   : > { %1397 = vmatprep.mubr.bf16.mxu0 %v2976_v62 }
 0x12d   : > { %1398 = vmatmul.mubr.bf16.gmra.mxu0 %v2978_v63 }
 0x12e   : > { %1407 = vmatprep.mubr.bf16.mxu0 %v2979_v0 }
 0x135   : > { %1408 = vmatmul.mubr.bf16.gmra.mxu0 %v2981_v3  ;;  %v3791_v3 = vpop.permute.xlu1 %1162 }
 0x136   : > { %1417 = vmatprep.mubr.bf16.mxu0 %v2982_v4  ;;  %v3793_v4 = vpop.permute.xlu0 %1157 }
 0x13d   : > { %1418 = vmatmul.mubr.bf16.gmra.mxu0 %v2984_v5 }
 0x13e   : > { %1427 = vmatprep.mubr.bf16.mxu0 %v2985_v6 }
 0x145   : > { %1428 = vmatmul.mubr.bf16.gmra.mxu0 %v2987_v7 }
 0x146   : > { %1437 = vmatprep.mubr.bf16.mxu0 %v2988_v10  ;;  %v3801_v10 = vpop.permute.xlu1 %1152 }
 0x14d   : > { %1438 = vmatmul.mubr.bf16.gmra.mxu0 %v2990_v11  ;;  %v3803_v11 = vpop.permute.xlu0 %1147 }
 0x14e   : > { %1447 = vmatprep.mubr.bf16.mxu0 %v2991_v12 }
 0x155   : > { %1448 = vmatmul.mubr.bf16.gmra.mxu0 %v2993_v13  ;;  %v3014_v13 = vld [vmem:[%s4451_s5 + $0x4] ss:$8 sps:$4 sm:$0xff]  }
 0x156   : > { %1457 = vmatprep.mubr.bf16.mxu0 %v2994_v14  ;;  %1966 = vmatprep.mubr.bf16.mxu1 %v3014_v13 }
 0x15d   : > { %1458 = vmatmul.mubr.bf16.gmra.mxu0 %v2996_v15 }
 0x15e   : > { %1467 = vmatprep.mubr.bf16.mxu0 %v2997_v16  ;;  %v3810_v16 = vpop.permute.xlu1 %1142 }
 0x15f   : > { %4481 = vst [vmem:[#allocation4_spill] sm:$0xff] %v3810_v16 }
 0x165   : > { %1468 = vmatmul.mubr.bf16.gmra.mxu0 %v2999_v17  ;;  %v3812_v17 = vpop.permute.xlu0 %1137 }
 0x166   : > { %1477 = vmatprep.mubr.bf16.mxu0 %v3000_v18  ;;  %4482 = vst [vmem:[#allocation5_spill] sm:$0xff] %v3812_v17 }
 0x16d   : > { %1478 = vmatmul.mubr.bf16.gmra.mxu0 %v3002_v19 }
 0x16e   : > { %1487 = vmatprep.mubr.bf16.mxu0 %v3003_v20 }
 0x175   : > { %1488 = vmatmul.mubr.bf16.gmra.mxu0 %v3005_v21  ;;  %v3814_v21 = vpop.permute.xlu1 %1132 }
 0x176   : > { %1497 = vmatprep.mubr.bf16.mxu0 %v3006_v22  ;;  %4483 = vst [vmem:[#allocation6_spill] sm:$0xff] %v3814_v21  ;;  %v3816_v22 = vpop.permute.xlu0 %1127 }
 0x177   : > { %4484 = vst [vmem:[#allocation7_spill] sm:$0xff] %v3816_v22 }
 0x17d   : > { %1498 = vmatmul.mubr.bf16.gmra.mxu0 %v3008_v23 }
 0x17e   : > { %1507 = vmatprep.mubr.bf16.mxu0 %v3009_v24 }
 0x185   : > { %1508 = vmatmul.mubr.bf16.gmra.mxu0 %v3011_v25 }
 0x1cd   : > { %v1359_v40 = vpop.f32.mrf.mxu0 }
 0x1ce   : > { %v3757_v45 = vadd.f32 %v1359_v40, %v1008_v43 }
 0x1cf   : > { %v1361_v41 = vpop.f32.mrf.mxu0 }
 0x1d0   : > { %v3761_v48 = vadd.f32 %v1361_v41, %v1008_v43 }
 0x1d1   : > { %v1363_v44 = vpop.f32.mrf.mxu0 }
 0x1d2   : > { %v3759_v46 = vadd.f32 %v1363_v44, %v1013_v42 }
 0x1d3   : > { %v1365_v47 = vpop.f32.mrf.mxu0 }
 0x1d4   : > { %v3765_v50 = vadd.f32 %v1365_v47, %v1013_v42 }
 0x1d5   : > { %v1369_v51 = vpop.f32.mrf.mxu0 }
 0x1d6   : > { %v3769_v9 = vadd.f32 %v1369_v51, %v1018_v39 }
 0x1d7   : > { %v1371_v8 = vpop.f32.mrf.mxu0 }
 0x1d8   : > { %v3773_v56 = vadd.f32 %v1371_v8, %v1018_v39  ;;  %v3820_v39 = vpop.permute.xlu0 %1117 }
 0x1d9   : > { %v1373_v53 = vpop.f32.mrf.mxu0  ;;  %4486 = vst [vmem:[#allocation9_spill] sm:$0xff] %v3820_v39 }
 0x1da   : > { %v3771_v54 = vadd.f32 %v1373_v53, %v1023_v38 }
 0x1db   : > { %v1375_v55 = vpop.f32.mrf.mxu0 }
 0x1dc   : > { %v3777_v58 = vadd.f32 %v1375_v55, %v1023_v38  ;;  %v3818_v38 = vpop.permute.xlu1 %1122  ;;  %v3824_v44 = vpop.permute.xlu0 %1107 }
 0x1dd   : > { %v3779_v59 = vpop.f32.mrf.mxu0  ;;  %4485 = vst [vmem:[#allocation8_spill] sm:$0xff] %v3818_v38  ;;  %4488 = vst [vmem:[#allocation11_spill] sm:$0xff] %v3824_v44 }
 0x1df   : > { %v3783_v61 = vpop.f32.mrf.mxu0 }
 0x1e0   : > { %v3822_v43 = vpop.permute.xlu1 %1112  ;;  %v1098_v55 = vpop.permute.xlu0 %1097 }
 0x1e1   : > { %v3785_v62 = vpop.f32.mrf.mxu0  ;;  %4487 = vst [vmem:[#allocation10_spill] sm:$0xff] %v3822_v43 }
 0x1e3   : > { %v3787_v63 = vpop.f32.mrf.mxu0 }
 0x1e4   : > { %v1103_v53 = vpop.permute.xlu1 %1102 }
 0x1e5   : > { %v3789_v0 = vpop.f32.mrf.mxu0 }
 0x1e7   : > { %v3795_v5 = vpop.f32.mrf.mxu0 }
 0x1e8   : > { %v1093_v21 = vpop.permute.xlu1 %1092 }
 0x1e9   : > { %v3797_v6 = vpop.f32.mrf.mxu0 }
 0x1eb   : > { %v3799_v7 = vpop.f32.mrf.mxu0 }
 0x1ed   : > { %v3805_v12 = vpop.f32.mrf.mxu0 }
 0x1ef   : > { %v1401_v14 = vpop.f32.mrf.mxu0 }
 0x1f1   : > { %v1403_v15 = vpop.f32.mrf.mxu0 }
 0x1f3   : > { %v1405_v18 = vpop.f32.mrf.mxu0 }
 0x1f5   : > { %v1409_v19 = vpop.f32.mrf.mxu0 }
 0x1f7   : > { %v1411_v20 = vpop.f32.mrf.mxu0 }
 0x1f9   : > { %v1413_v23 = vpop.f32.mrf.mxu0 }
 0x1fb   : > { %v1415_v24 = vpop.f32.mrf.mxu0 }
 0x1fd   : > { %v1419_v25 = vpop.f32.mrf.mxu0 }
 0x1ff   : > { %v1421_v40 = vpop.f32.mrf.mxu0 }
 0x200   : > { %v1422_v43 = vadd.f32 %v1421_v40, %v3739_v29 }
 0x201   : > { %v1423_v41 = vpop.f32.mrf.mxu0 }
 0x202   : > { %v1424_v39 = vadd.f32 %v1423_v41, %v3737_v28 }
 0x203   : > { %v1425_v42 = vpop.f32.mrf.mxu0 }
 0x204   : > { %v1426_v52 = vadd.f32 %v1425_v42, %v3737_v28  ;;  %v1088_v42 = vpop.permute.xlu0 %1087  ;;  %v1406_v28 = vadd.f32 %v1405_v18, %v3745_v32 }
 0x205   : > { %v1429_v47 = vpop.f32.mrf.mxu0 }
 0x206   : > { %v1430_v2 = vadd.f32 %v1429_v47, %v3735_v27  ;;  %v1563_v17 = vpack.c.bf16 %v1426_v52, %v1422_v43  ;;  %v1390_v43 = vadd.f32 %v3789_v0, %v3751_v35 }
 0x207   : > { %v1431_v51 = vpop.f32.mrf.mxu0 }
 0x208   : > { %v1432_v57 = vadd.f32 %v1431_v51, %v3735_v27  ;;  %v1420_v51 = vadd.f32 %v1419_v25, %v3739_v29  ;;  %v1396_v25 = vadd.f32 %v3799_v7, %v3749_v34  ;;  %v1394_v7 = vadd.f32 %v3797_v6, %v3749_v34 }
 0x209   : > { %v1433_v8 = vpop.f32.mrf.mxu0  ;;  %v1384_v6 = vadd.f32 %v3785_v62, %v3753_v36 }
 0x20a   : > { %v1434_v13 = vadd.f32 %v1433_v8, %v3733_v26  ;;  %v1416_v8 = vadd.f32 %v1415_v24, %v3741_v30  ;;  %v1556_v47 = vpack.c.bf16 %v1394_v7, %v1390_v43  ;;  %v4493_v7 = vld [vmem:[#allocation4_spill] sm:$0xff]  ;;  %v4494_v43 = vld [vmem:[#allocation5_spill] sm:$0xff] }
 0x20b   : > { %v1435_v49 = vpop.f32.mrf.mxu0 }
 0x20c   : > { %v1436_v60 = vadd.f32 %v1435_v49, %v3733_v26  ;;  %v1564_v22 = vpack.c.bf16 %v1434_v13, %v1430_v2  ;;  %v1412_v26 = vadd.f32 %v1411_v20, %v3743_v31  ;;  %v1414_v2 = vadd.f32 %v1413_v23, %v3741_v30 }
 0x20d   : > { %v1439_v1 = vpop.f32.mrf.mxu0  ;;  %v1404_v30 = vadd.f32 %v1403_v15, %v3745_v32  ;;  %v1386_v32 = vadd.f32 %v3787_v63, %v3753_v36  ;;  %v1382_v63 = vadd.f32 %v3783_v61, %v3755_v37 }
 0x20e   : > { %v1565_v44 = vpack.c.bf16 %v1436_v60, %v1432_v57  ;;  %v3836_v27 = vadd.f32 %v1439_v1, %v1088_v42  ;;  %v1562_v57 = vpack.c.bf16 %v1424_v39, %v1420_v51  ;;  %v1561_v52 = vpack.c.bf16 %v1416_v8, %v1412_v26 }
 0x20f   : > { %v1441_v38 = vpop.f32.mrf.mxu0  ;;  %v1410_v1 = vadd.f32 %v1409_v19, %v3743_v31  ;;  %v4490_v51 = vpack.c.bf16 %v3771_v54, %v3769_v9 }
 0x210   : > { %1934 = vmatprep.subr.bf16.mxu1 %v1565_v44  ;;  %v3842_v24 = vadd.f32 %v1441_v38, %v1088_v42  ;;  %v4489_v42 = vpack.c.bf16 %v3777_v58, %v3773_v56 }
 0x211   : > { %v1443_v16 = vpop.f32.mrf.mxu0  ;;  %1935 = vmatpush1.bf16.msra.mxu1 %v1564_v22  ;;  %v1560_v18 = vpack.c.bf16 %v1414_v2, %v1410_v1 }
 0x212   : > { %v3838_v49 = vadd.f32 %v1443_v16, %v1093_v21  ;;  %1936 = vmatprep.subr.bf16.mxu1 %v1563_v17  ;;  %v1402_v16 = vadd.f32 %v1401_v14, %v3747_v33  ;;  %v1392_v14 = vadd.f32 %v3795_v5, %v3751_v35  ;;  %v1380_v35 = vadd.f32 %v3779_v59, %v3755_v37 }
 0x213   : > { %v1445_v60 = vpop.f32.mrf.mxu0  ;;  %v4491_v37 = vpack.c.bf16 %v3765_v50, %v3761_v48 }
 0x214   : > { %v1566_v29 = vpack.c.bf16 %v3838_v49, %v3836_v27  ;;  %v3846_v22 = vadd.f32 %v1445_v60, %v1093_v21  ;;  %v1559_v38 = vpack.c.bf16 %v1406_v28, %v1402_v16  ;;  %v1400_v21 = vadd.f32 %v3805_v12, %v3747_v33  ;;  %v3020_v27 = vld [vmem:[%s4451_s5 + $0x20] ss:$8 sps:$4 sm:$0xff]   ;;  %v3021_v49 = vld [vmem:[%s4451_s5 + $0x34] ss:$8 sps:$4 sm:$0xff]  }
 0x215   : > { %v1449_v20 = vpop.f32.mrf.mxu0  ;;  %1937 = vmatpush1.bf16.msra.mxu1 %v1562_v57  ;;  %v1557_v41 = vpack.c.bf16 %v1396_v25, %v1392_v14  ;;  %v1554_v13 = vpack.c.bf16 %v1384_v6, %v1380_v35  ;;  %v4492_v28 = vpack.c.bf16 %v3759_v46, %v3757_v45 }
 0x216   : > { %v1567_v17 = vpack.c.bf16 %v3846_v22, %v3842_v24  ;;  %1938 = vmatprep.subr.bf16.mxu1 %v1561_v52  ;;  %v3859_v19 = vadd.f32 %v1449_v20, %v1098_v55  ;;  %v1558_v15 = vpack.c.bf16 %v1404_v30, %v1400_v21  ;;  %v3018_v24 = vld [vmem:[%s4451_s5 + $0x24] ss:$8 sps:$4 sm:$0xff]  }
 0x217   : > { %v1451_v23 = vpop.f32.mrf.mxu0  ;;  %v3024_v22 = vld [vmem:[%s4451_s5 + $0x44] ss:$8 sps:$4 sm:$0xff]  }
 0x218   : > { %v3867_v33 = vadd.f32 %v1451_v23, %v1098_v55 }
 0x219   : > { %v1453_v31 = vpop.f32.mrf.mxu0  ;;  %1939 = vmatpush1.bf16.msra.mxu1 %v1560_v18 }
 0x21a   : > { %v3861_v39 = vadd.f32 %v1453_v31, %v1103_v53  ;;  %1940 = vmatprep.subr.bf16.mxu1 %v1559_v38 }
 0x21b   : > { %v1455_v40 = vpop.f32.mrf.mxu0 }
 0x21c   : > { %v1568_v12 = vpack.c.bf16 %v3861_v39, %v3859_v19  ;;  %v3871_v5 = vadd.f32 %v1455_v40, %v1103_v53  ;;  %v1555_v53 = vpack.c.bf16 %v1386_v32, %v1382_v63  ;;  %v3017_v19 = vld [vmem:[%s4451_s5 + $0x10] ss:$8 sps:$4 sm:$0xff]   ;;  %v3027_v39 = vld [vmem:[%s4451_s5 + $0x54] ss:$8 sps:$4 sm:$0xff]  }
 0x21d   : > { %v3875_v44 = vpop.f32.mrf.mxu0  ;;  %1941 = vmatpush1.bf16.msra.mxu1 %v1558_v15 }
 0x21e   : > { %v1569_v34 = vpack.c.bf16 %v3871_v5, %v3867_v33  ;;  %1942 = vmatprep.subr.bf16.mxu1 %v1557_v41  ;;  %v3015_v33 = vld [vmem:[%s4451_s5 + $0x14] ss:$8 sps:$4 sm:$0xff]   ;;  %v3030_v5 = vld [vmem:[%s4451_s5 + $0x64] ss:$8 sps:$4 sm:$0xff]  }
 0x21f   : > { %v3883_v55 = vpop.f32.mrf.mxu0 }
 0x221   : > { %v3887_v0 = vpop.f32.mrf.mxu0  ;;  %1943 = vmatpush1.bf16.msra.mxu1 %v1556_v47 }
 0x222   : > { %1944 = vmatprep.subr.bf16.mxu1 %v1555_v53 }
 0x223   : > { %v1465_v61 = vpop.f32.mrf.mxu0 }
 0x225   : > { %v1469_v8 = vpop.f32.mrf.mxu0  ;;  %1945 = vmatpush1.bf16.msra.mxu1 %v1554_v13 }
 0x226   : > { %1946 = vmatprep.subr.bf16.mxu1 %v4489_v42 }
 0x227   : > { %v1471_v36 = vpop.f32.mrf.mxu0 }
 0x229   : > { %v1473_v62 = vpop.f32.mrf.mxu0  ;;  %1947 = vmatpush1.bf16.msra.mxu1 %v4490_v51 }
 0x22a   : > { %1948 = vmatprep.subr.bf16.mxu1 %v4491_v37 }
 0x22b   : > { %v1475_v59 = vpop.f32.mrf.mxu0 }
 0x22d   : > { %v1479_v26 = vpop.f32.mrf.mxu0  ;;  %1949 = vmatpush1.bf16.msra.mxu1 %v4492_v28 }
 0x22f   : > { %v1481_v2 = vpop.f32.mrf.mxu0 }
 0x231   : > { %v1483_v57 = vpop.f32.mrf.mxu0 }
 0x233   : > { %v1485_v56 = vpop.f32.mrf.mxu0 }
 0x235   : > { %v1489_v58 = vpop.f32.mrf.mxu0 }
 0x236   : > { %v1490_v35 = vadd.f32 %v1489_v58, %v4494_v43  ;;  %v4499_v58 = vld [vmem:[#allocation10_spill] sm:$0xff] }
 0x237   : > { %v1491_v60 = vpop.f32.mrf.mxu0 }
 0x238   : > { %v1492_v63 = vadd.f32 %v1491_v60, %v4494_v43 }
 0x239   : > { %v1493_v52 = vpop.f32.mrf.mxu0 }
 0x23b   : > { %v1495_v1 = vpop.f32.mrf.mxu0 }
 0x23c   : > { %v1496_v15 = vadd.f32 %v1495_v1, %v4493_v7 }
 0x23d   : > { %v1499_v20 = vpop.f32.mrf.mxu0 }
 0x23e   : > { %v1500_v41 = vadd.f32 %v1499_v20, %v3803_v11  ;;  %v1577_v53 = vpack.c.bf16 %v1496_v15, %v1492_v63  ;;  %v3059_v15 = vld [vmem:[%s4451_s5 + $0xf0] ss:$8 sps:$4 sm:$0xff]  }
 0x23f   : > { %v1501_v9 = vpop.f32.mrf.mxu0 }
 0x240   : > { %v1502_v21 = vadd.f32 %v1501_v9, %v3803_v11  ;;  %v4497_v11 = vld [vmem:[#allocation8_spill] sm:$0xff]  ;;  %v1466_v9 = vadd.f32 %v1465_v61, %v4499_v58  ;;  %v3036_v61 = vld [vmem:[%s4451_s5 + $0x84] ss:$8 sps:$4 sm:$0xff]  }
 0x241   : > { %v1503_v54 = vpop.f32.mrf.mxu0  ;;  %v1476_v37 = vadd.f32 %v1475_v59, %v4497_v11  ;;  %v1464_v59 = vadd.f32 %v3887_v0, %v4499_v58  ;;  %v3035_v0 = vld [vmem:[%s4451_s5 + $0x70] ss:$8 sps:$4 sm:$0xff]  }
 0x242   : > { %v1504_v14 = vadd.f32 %v1503_v54, %v3801_v10 }
 0x243   : > { %v1505_v16 = vpop.f32.mrf.mxu0 }
 0x244   : > { %v1506_v45 = vadd.f32 %v1505_v16, %v3801_v10  ;;  %v1578_v6 = vpack.c.bf16 %v1504_v14, %v1500_v41  ;;  %v4496_v10 = vld [vmem:[#allocation7_spill] sm:$0xff]  ;;  %v4035_v41 = vpop.permute.xlu0 %1686 }
 0x245   : > { %v1509_v30 = vpop.f32.mrf.mxu0  ;;  %v1482_v13 = vadd.f32 %v1481_v2, %v4496_v10  ;;  %v1480_v60 = vadd.f32 %v1479_v26, %v4496_v10  ;;  %v3054_v14 = vld [vmem:[%s4451_s5 + $0xe4] ss:$8 sps:$4 sm:$0xff]  }
 0x246   : > { %v1510_v38 = vadd.f32 %v1509_v30, %v3793_v4  ;;  %v1579_v40 = vpack.c.bf16 %v1506_v45, %v1502_v21  ;;  %v3045_v45 = vld [vmem:[%s4451_s5 + $0xb4] ss:$8 sps:$4 sm:$0xff]  }
 0x247   : > { %v1511_v48 = vpop.f32.mrf.mxu0  ;;  %v3051_v21 = vld [vmem:[%s4451_s5 + $0xd4] ss:$8 sps:$4 sm:$0xff]  }
 0x248   : > { %v1512_v46 = vadd.f32 %v1511_v48, %v3793_v4  ;;  %v4495_v4 = vld [vmem:[#allocation6_spill] sm:$0xff]  ;;  %v3039_v48 = vld [vmem:[%s4451_s5 + $0x94] ss:$8 sps:$4 sm:$0xff]   ;;  %v4039_v63 = vpop.permute.xlu0 %1676 }
 0x249   : > { %v1513_v50 = vpop.f32.mrf.mxu0  ;;  %v1486_v47 = vadd.f32 %v1485_v56, %v4495_v4  ;;  %v1484_v42 = vadd.f32 %v1483_v57, %v4495_v4  ;;  %v1474_v56 = vadd.f32 %v1473_v62, %v4497_v11  ;;  %v4500_v57 = vld [vmem:[#allocation11_spill] sm:$0xff] }
 0x24a   : > { %v1514_v18 = vadd.f32 %v1513_v50, %v3791_v3  ;;  %v1462_v16 = vadd.f32 %v3883_v55, %v4500_v57  ;;  %v3033_v55 = vld [vmem:[%s4451_s5 + $0x74] ss:$8 sps:$4 sm:$0xff]   ;;  %v3041_v50 = vld [vmem:[%s4451_s5 + $0x90] ss:$8 sps:$4 sm:$0xff]  }
 0x24b   : > { %v1515_v23 = vpop.f32.mrf.mxu0  ;;  %v1575_v28 = vpack.c.bf16 %v1486_v47, %v1482_v13  ;;  %v1574_v20 = vpack.c.bf16 %v1484_v42, %v1480_v60 }
 0x24c   : > { %v1516_v25 = vadd.f32 %v1515_v23, %v3791_v3  ;;  %v1580_v32 = vpack.c.bf16 %v1514_v18, %v1510_v38  ;;  %v1494_v3 = vadd.f32 %v1493_v52, %v4493_v7  ;;  %v4498_v52 = vld [vmem:[#allocation9_spill] sm:$0xff]  ;;  %v1571_v30 = vpack.c.bf16 %v1466_v9, %v1462_v16  ;;  %v3042_v18 = vld [vmem:[%s4451_s5 + $0xa4] ss:$8 sps:$4 sm:$0xff]   ;;  %v3044_v23 = vld [vmem:[%s4451_s5 + $0xa0] ss:$8 sps:$4 sm:$0xff]  }
 0x24d   : > { %v1472_v1 = vadd.f32 %v1471_v36, %v4498_v52  ;;  %v1470_v2 = vadd.f32 %v1469_v8, %v4498_v52  ;;  %v1460_v36 = vadd.f32 %v3875_v44, %v4500_v57  ;;  %v3012_v44 = vld [vmem:[%s4451_s5] ss:$8 sps:$4 sm:$0xff]   ;;  %v3057_v7 = vld [vmem:[%s4451_s5 + $0xf4] ss:$8 sps:$4 sm:$0xff]  }
 0x24e   : > { %v1581_v31 = vpack.c.bf16 %v1516_v25, %v1512_v46  ;;  %v1576_v51 = vpack.c.bf16 %v1494_v3, %v1490_v35  ;;  %v3038_v8 = vld [vmem:[%s4451_s5 + $0x80] ss:$8 sps:$4 sm:$0xff]   ;;  %v3047_v46 = vld [vmem:[%s4451_s5 + $0xb0] ss:$8 sps:$4 sm:$0xff]   ;;  %v3048_v25 = vld [vmem:[%s4451_s5 + $0xc4] ss:$8 sps:$4 sm:$0xff]  }
 0x24f   : > { %v1573_v54 = vpack.c.bf16 %v1476_v37, %v1472_v1  ;;  %v1572_v26 = vpack.c.bf16 %v1474_v56, %v1470_v2  ;;  %v1570_v62 = vpack.c.bf16 %v1464_v59, %v1460_v36  ;;  %v3050_v38 = vld [vmem:[%s4451_s5 + $0xc0] ss:$8 sps:$4 sm:$0xff]  }
 0x250   : > { %1950 = vmatprep.subr.bf16.mxu1 %v1581_v31  ;;  %v3053_v31 = vld [vmem:[%s4451_s5 + $0xd0] ss:$8 sps:$4 sm:$0xff]  }
 0x251   : > { %1951 = vmatpush2.bf16.msra.mxu1 %v1580_v32  ;;  %v3056_v32 = vld [vmem:[%s4451_s5 + $0xe0] ss:$8 sps:$4 sm:$0xff]  }
 0x252   : > { %1952 = vmatprep.subr.bf16.mxu1 %v1579_v40  ;;  %v4033_v40 = vpop.permute.xlu1 %1691 }
 0x255   : > { %1953 = vmatpush2.bf16.msra.mxu1 %v1578_v6  ;;  %v4043_v6 = vpop.permute.xlu0 %1666 }
 0x256   : > { %1954 = vmatprep.subr.bf16.mxu1 %v1577_v53  ;;  %v4037_v43 = vpop.permute.xlu1 %1681 }
 0x259   : > { %1955 = vmatpush2.bf16.msra.mxu1 %v1576_v51  ;;  %v4047_v47 = vpop.permute.xlu0 %1656 }
 0x25a   : > { %1956 = vmatprep.subr.bf16.mxu1 %v1575_v28  ;;  %v4041_v3 = vpop.permute.xlu1 %1671 }
 0x25d   : > { %1957 = vmatpush2.bf16.msra.mxu1 %v1574_v20  ;;  %v4051_v35 = vpop.permute.xlu0 %1646 }
 0x25e   : > { %1958 = vmatprep.subr.bf16.mxu1 %v1573_v54  ;;  %v4045_v4 = vpop.permute.xlu1 %1661 }
 0x261   : > { %1959 = vmatpush2.bf16.msra.mxu1 %v1572_v26  ;;  %v4055_v13 = vpop.permute.xlu0 %1636 }
 0x262   : > { %1960 = vmatprep.subr.bf16.mxu1 %v1571_v30  ;;  %v4049_v53 = vpop.permute.xlu1 %1651 }
 0x265   : > { %1961 = vmatpush2.bf16.msra.mxu1 %v1570_v62  ;;  %v1627_v51 = vpop.permute.xlu0 %1626 }
 0x266   : > { %1962 = vmatprep.subr.bf16.mxu1 %v1569_v34  ;;  %v3032_v34 = vld [vmem:[%s4451_s5 + $0x60] ss:$8 sps:$4 sm:$0xff]   ;;  %v4053_v10 = vpop.permute.xlu1 %1641 }
 0x269   : > { %1963 = vmatpush2.bf16.msra.mxu1 %v1568_v12  ;;  %v3029_v12 = vld [vmem:[%s4451_s5 + $0x50] ss:$8 sps:$4 sm:$0xff]   ;;  %v1617_v60 = vpop.permute.xlu0 %1616 }
 0x26a   : > { %1964 = vmatprep.subr.bf16.mxu1 %v1567_v17  ;;  %v3026_v17 = vld [vmem:[%s4451_s5 + $0x40] ss:$8 sps:$4 sm:$0xff]   ;;  %v1632_v42 = vpop.permute.xlu1 %1631 }
 0x26d   : > { %1965 = vmatpush2.bf16.msra.mxu1 %v1566_v29  ;;  %v3023_v29 = vld [vmem:[%s4451_s5 + $0x30] ss:$8 sps:$4 sm:$0xff]  }
 0x26e   : > { %v1622_v28 = vpop.permute.xlu1 %1621 }
 0x270   : > { %1967 = vmatmul.mubr.bf16.vlgmr.msra.gmra.mxu1 %v3012_v44 }
 0x271   : > { %1976 = vmatprep.mubr.bf16.mxu1 %v3015_v33 }
 0x278   : > { %1977 = vmatmul.mubr.bf16.gmra.mxu1 %v3017_v19 }
 0x279   : > { %1986 = vmatprep.mubr.bf16.mxu1 %v3018_v24 }
 0x280   : > { %1987 = vmatmul.mubr.bf16.gmra.mxu1 %v3020_v27 }
 0x281   : > { %1996 = vmatprep.mubr.bf16.mxu1 %v3021_v49 }
 0x288   : > { %1997 = vmatmul.mubr.bf16.gmra.mxu1 %v3023_v29 }
 0x289   : > { %2006 = vmatprep.mubr.bf16.mxu1 %v3024_v22 }
 0x290   : > { %2007 = vmatmul.mubr.bf16.gmra.mxu1 %v3026_v17  ;;  %v4091_v17 = vpop.permute.xlu1 %1771 }
 0x291   : > { %2016 = vmatprep.mubr.bf16.mxu1 %v3027_v39  ;;  %v4093_v39 = vpop.permute.xlu0 %1766 }
 0x298   : > { %2017 = vmatmul.mubr.bf16.gmra.mxu1 %v3029_v12 }
 0x299   : > { %2026 = vmatprep.mubr.bf16.mxu1 %v3030_v5 }
 0x2a0   : > { %2027 = vmatmul.mubr.bf16.gmra.mxu1 %v3032_v34 }
 0x2a1   : > { %2036 = vmatprep.mubr.bf16.mxu1 %v3033_v55  ;;  %v4101_v55 = vpop.permute.xlu1 %1761 }
 0x2a8   : > { %2037 = vmatmul.mubr.bf16.gmra.mxu1 %v3035_v0  ;;  %v4106_v0 = vld.sshfl [vmem:[%s4453_s7] sm:$0x33 pattern:$0x76325410] }
 0x2a9   : > { %2046 = vmatprep.mubr.bf16.mxu1 %v3036_v61  ;;  %4501 = vst [vmem:[#allocation4_spill] sm:$0xff] %v4106_v0  ;;  %v4108_v61 = vpop.permute.xlu0 %1756 }
 0x2b0   : > { %2047 = vmatmul.mubr.bf16.gmra.mxu1 %v3038_v8 }
 0x2b1   : > { %2056 = vmatprep.mubr.bf16.mxu1 %v3039_v48  ;;  %v2168_v48 = vcombine.high %v4106_v0, %v4106_v0 }
 0x2b3   : > { %2203 = vmatprep.mubr.bf16.mxu0 %v2168_v48 }
 0x2b8   : > { %2057 = vmatmul.mubr.bf16.gmra.mxu1 %v3041_v50 }
 0x2b9   : > { %2066 = vmatprep.mubr.bf16.mxu1 %v3042_v18  ;;  %v3060_v18 = vld [vmem:[%s4456_s10 + $0x78] sm:$0xff]  }
 0x2ba   : > { %2880 = vmatprep.subr.bf16.mxu1 %v3060_v18 }
 0x2c0   : > { %2067 = vmatmul.mubr.bf16.gmra.mxu1 %v3044_v23  ;;  %v3061_v23 = vld [vmem:[%s4456_s10 + $0x38] sm:$0xff]  }
 0x2c1   : > { %2076 = vmatprep.mubr.bf16.mxu1 %v3045_v45  ;;  %v3062_v45 = vld [vmem:[%s4456_s10 + $0x70] sm:$0xff]   ;;  %2881 = vmatpush3.bf16.msra.mxu1 %v3061_v23 }
 0x2c2   : > { %2882 = vmatprep.subr.bf16.mxu1 %v3062_v45 }
 0x2c8   : > { %2077 = vmatmul.mubr.bf16.gmra.mxu1 %v3047_v46 }
 0x2c9   : > { %2086 = vmatprep.mubr.bf16.mxu1 %v3048_v25  ;;  %v4127_v25 = vpop.permute.xlu1 %1751 }
 0x2ca   : > { %4502 = vst [vmem:[#allocation5_spill] sm:$0xff] %v4127_v25 }
 0x2d0   : > { %2087 = vmatmul.mubr.bf16.gmra.mxu1 %v3050_v38  ;;  %v4129_v38 = vpop.permute.xlu0 %1746 }
 0x2d1   : > { %2096 = vmatprep.mubr.bf16.mxu1 %v3051_v21  ;;  %4503 = vst [vmem:[#allocation6_spill] sm:$0xff] %v4129_v38 }
 0x2d8   : > { %2097 = vmatmul.mubr.bf16.gmra.mxu1 %v3053_v31  ;;  %v3063_v31 = vld [vmem:[%s4456_s10 + $0x30] sm:$0xff]  }
 0x2d9   : > { %2106 = vmatprep.mubr.bf16.mxu1 %v3054_v14  ;;  %v3064_v14 = vld [vmem:[%s4456_s10 + $0x68] sm:$0xff]   ;;  %2883 = vmatpush3.bf16.msra.mxu1 %v3063_v31 }
 0x2da   : > { %2884 = vmatprep.subr.bf16.mxu1 %v3064_v14 }
 0x2e0   : > { %2107 = vmatmul.mubr.bf16.gmra.mxu1 %v3056_v32 }
 0x2e1   : > { %2116 = vmatprep.mubr.bf16.mxu1 %v3057_v7 }
 0x2e8   : > { %2117 = vmatmul.mubr.bf16.gmra.mxu1 %v3059_v15  ;;  %v3065_v15 = vld [vmem:[%s4456_s10 + $0x28] sm:$0xff]  }
 0x2e9   : > { %2885 = vmatpush3.bf16.msra.mxu1 %v3065_v15 }
 0x330   : > { %v1968_v11 = vpop.f32.mrf.mxu1 }
 0x331   : > { %v4057_v1 = vadd.f32 %v1968_v11, %v1617_v60  ;;  %v4147_v11 = vpop.permute.xlu0 %1736 }
 0x332   : > { %v1970_v37 = vpop.f32.mrf.mxu1  ;;  %4505 = vst [vmem:[#allocation8_spill] sm:$0xff] %v4147_v11 }
 0x333   : > { %v4061_v58 = vadd.f32 %v1970_v37, %v1617_v60  ;;  %v3067_v60 = vld [vmem:[%s4456_s10 + $0x20] sm:$0xff]  }
 0x334   : > { %v1972_v52 = vpop.f32.mrf.mxu1 }
 0x335   : > { %v4059_v56 = vadd.f32 %v1972_v52, %v1622_v28  ;;  %v3068_v52 = vld [vmem:[%s4456_s10 + $0x58] sm:$0xff]  }
 0x336   : > { %v1974_v20 = vpop.f32.mrf.mxu1 }
 0x337   : > { %v4065_v54 = vadd.f32 %v1974_v20, %v1622_v28 }
 0x338   : > { %v1978_v2 = vpop.f32.mrf.mxu1 }
 0x339   : > { %v4069_v26 = vadd.f32 %v1978_v2, %v1627_v51 }
 0x33a   : > { %v1980_v16 = vpop.f32.mrf.mxu1 }
 0x33b   : > { %v4073_v62 = vadd.f32 %v1980_v16, %v1627_v51  ;;  %v3066_v51 = vld [vmem:[%s4456_s10 + $0x60] sm:$0xff]   ;;  %v4157_v16 = vpop.permute.xlu0 %1726 }
 0x33c   : > { %v1982_v59 = vpop.f32.mrf.mxu1  ;;  %2886 = vmatprep.subr.bf16.mxu1 %v3066_v51  ;;  %4507 = vst [vmem:[#allocation10_spill] sm:$0xff] %v4157_v16 }
 0x33d   : > { %v4071_v30 = vadd.f32 %v1982_v59, %v1632_v42  ;;  %2887 = vmatpush3.bf16.msra.mxu1 %v3067_v60 }
 0x33e   : > { %v1984_v36 = vpop.f32.mrf.mxu1  ;;  %2888 = vmatprep.subr.bf16.mxu1 %v3068_v52 }
 0x33f   : > { %v4077_v33 = vadd.f32 %v1984_v36, %v1632_v42  ;;  %v4142_v42 = vpop.permute.xlu1 %1741  ;;  %v3069_v36 = vld [vmem:[%s4456_s10 + $0x18] sm:$0xff]   ;;  %v4164_v45 = vpop.permute.xlu0 %1716 }
 0x340   : > { %v4079_v19 = vpop.f32.mrf.mxu1  ;;  %4504 = vst [vmem:[#allocation7_spill] sm:$0xff] %v4142_v42  ;;  %4509 = vst [vmem:[#allocation12_spill] sm:$0xff] %v4164_v45 }
 0x341   : > { %2889 = vmatpush3.bf16.msra.mxu1 %v3069_v36 }
 0x342   : > { %v4083_v27 = vpop.f32.mrf.mxu1 }
 0x343   : > { %v4155_v2 = vpop.permute.xlu1 %1731  ;;  %v1707_v9 = vpop.permute.xlu0 %1706 }
 0x344   : > { %v4085_v49 = vpop.f32.mrf.mxu1  ;;  %4506 = vst [vmem:[#allocation9_spill] sm:$0xff] %v4155_v2 }
 0x346   : > { %v4087_v29 = vpop.f32.mrf.mxu1 }
 0x347   : > { %v4162_v23 = vpop.permute.xlu1 %1721 }
 0x348   : > { %v4089_v22 = vpop.f32.mrf.mxu1  ;;  %4508 = vst [vmem:[#allocation11_spill] sm:$0xff] %v4162_v23 }
 0x34a   : > { %v4095_v12 = vpop.f32.mrf.mxu1 }
 0x34b   : > { %v1712_v51 = vpop.permute.xlu1 %1711 }
 0x34c   : > { %v4097_v5 = vpop.f32.mrf.mxu1 }
 0x34e   : > { %v4099_v34 = vpop.f32.mrf.mxu1 }
 0x34f   : > { %v1702_v42 = vpop.permute.xlu1 %1701 }
 0x350   : > { %v4110_v8 = vpop.f32.mrf.mxu1 }
 0x352   : > { %v4114_v50 = vpop.f32.mrf.mxu1 }
 0x354   : > { %v4125_v46 = vpop.f32.mrf.mxu1 }
 0x356   : > { %v2014_v21 = vpop.f32.mrf.mxu1 }
 0x358   : > { %v4137_v32 = vpop.f32.mrf.mxu1 }
 0x35a   : > { %v2020_v7 = vpop.f32.mrf.mxu1 }
 0x35c   : > { %v2022_v37 = vpop.f32.mrf.mxu1 }
 0x35e   : > { %v2024_v28 = vpop.f32.mrf.mxu1 }
 0x360   : > { %v2028_v20 = vpop.f32.mrf.mxu1 }
 0x362   : > { %v2030_v59 = vpop.f32.mrf.mxu1 }
 0x363   : > { %v2031_v23 = vadd.f32 %v2030_v59, %v4039_v63 }
 0x364   : > { %v2032_v48 = vpop.f32.mrf.mxu1 }
 0x365   : > { %v2033_v16 = vadd.f32 %v2032_v48, %v4037_v43 }
 0x366   : > { %v2034_v18 = vpop.f32.mrf.mxu1 }
 0x367   : > { %v2035_v44 = vadd.f32 %v2034_v18, %v4037_v43  ;;  %v1697_v18 = vpop.permute.xlu0 %1696  ;;  %v2015_v43 = vadd.f32 %v2014_v21, %v4045_v4  ;;  %v2013_v21 = vadd.f32 %v4125_v46, %v4045_v4  ;;  %v1995_v4 = vadd.f32 %v4087_v29, %v4053_v10 }
 0x368   : > { %v2038_v31 = vpop.f32.mrf.mxu1  ;;  %v1991_v29 = vadd.f32 %v4083_v27, %v4055_v13 }
 0x369   : > { %v2039_v36 = vadd.f32 %v2038_v31, %v4035_v41  ;;  %v2141_v38 = vpack.c.bf16 %v2035_v44, %v2031_v23  ;;  %v1999_v31 = vadd.f32 %v4089_v22, %v4051_v35 }
 0x36a   : > { %v2040_v14 = vpop.f32.mrf.mxu1 }
 0x36b   : > { %v2041_v24 = vadd.f32 %v2040_v14, %v4035_v41  ;;  %v2029_v14 = vadd.f32 %v2028_v20, %v4039_v63 }
 0x36c   : > { %v2042_v15 = vpop.f32.mrf.mxu1 }
 0x36d   : > { %v2043_v57 = vadd.f32 %v2042_v15, %v4033_v40  ;;  %v2025_v15 = vadd.f32 %v2024_v28, %v4041_v3 }
 0x36e   : > { %v2044_v60 = vpop.f32.mrf.mxu1 }
 0x36f   : > { %v2045_v52 = vadd.f32 %v2044_v60, %v4033_v40  ;;  %v2142_v2 = vpack.c.bf16 %v2043_v57, %v2039_v36  ;;  %v2021_v40 = vadd.f32 %v2020_v7, %v4043_v6  ;;  %v2023_v57 = vadd.f32 %v2022_v37, %v4041_v3 }
 0x370   : > { %v2048_v0 = vpop.f32.mrf.mxu1 }
 0x371   : > { %v2143_v45 = vpack.c.bf16 %v2045_v52, %v2041_v24  ;;  %v4176_v41 = vadd.f32 %v2048_v0, %v1697_v18  ;;  %v2140_v24 = vpack.c.bf16 %v2033_v16, %v2029_v14  ;;  %v2139_v44 = vpack.c.bf16 %v2025_v15, %v2021_v40 }
 0x372   : > { %v2050_v11 = vpop.f32.mrf.mxu1  ;;  %v2019_v0 = vadd.f32 %v4137_v32, %v4043_v6  ;;  %v2009_v6 = vadd.f32 %v4110_v8, %v4047_v47  ;;  %v4511_v14 = vpack.c.bf16 %v4071_v30, %v4069_v26 }
 0x373   : > { %2171 = vmatprep.subr.bf16.mxu0 %v2143_v45  ;;  %v4182_v48 = vadd.f32 %v2050_v11, %v1697_v18  ;;  %v4510_v18 = vpack.c.bf16 %v4077_v33, %v4073_v62 }
 0x374   : > { %v2052_v25 = vpop.f32.mrf.mxu1  ;;  %2172 = vmatpush1.bf16.msra.mxu0 %v2142_v2  ;;  %v2138_v7 = vpack.c.bf16 %v2023_v57, %v2019_v0  ;;  %v2136_v46 = vpack.c.bf16 %v2013_v21, %v2009_v6 }
 0x375   : > { %v4178_v59 = vadd.f32 %v2052_v25, %v1702_v42  ;;  %2173 = vmatprep.subr.bf16.mxu0 %v2141_v38  ;;  %v2011_v38 = vadd.f32 %v4114_v50, %v4047_v47  ;;  %v2001_v50 = vadd.f32 %v4095_v12, %v4051_v35  ;;  %v1989_v35 = vadd.f32 %v4079_v19, %v4055_v13 }
 0x376   : > { %v2054_v28 = vpop.f32.mrf.mxu1  ;;  %v4512_v13 = vpack.c.bf16 %v4065_v54, %v4061_v58 }
 0x377   : > { %v2144_v63 = vpack.c.bf16 %v4178_v59, %v4176_v41  ;;  %v4186_v20 = vadd.f32 %v2054_v28, %v1702_v42  ;;  %v2005_v42 = vadd.f32 %v4099_v34, %v4049_v53  ;;  %v2137_v37 = vpack.c.bf16 %v2015_v43, %v2011_v38  ;;  %v4301_v41 = vld [vmem:[%s4456_s10 + $0xb0] sm:$0xff]   ;;  %v4308_v59 = vld [vmem:[%s4456_s10 + $0xe8] sm:$0xff]  }
 0x378   : > { %v2058_v25 = vpop.f32.mrf.mxu1  ;;  %2174 = vmatpush1.bf16.msra.mxu0 %v2140_v24  ;;  %v2003_v34 = vadd.f32 %v4097_v5, %v4049_v53  ;;  %v4513_v43 = vpack.c.bf16 %v4059_v56, %v4057_v1 }
 0x379   : > { %v2145_v3 = vpack.c.bf16 %v4186_v20, %v4182_v48  ;;  %2175 = vmatprep.subr.bf16.mxu0 %v2139_v44  ;;  %v4202_v2 = vadd.f32 %v2058_v25, %v1707_v9  ;;  %v2135_v45 = vpack.c.bf16 %v2005_v42, %v2001_v50  ;;  %v4296_v48 = vld [vmem:[%s4456_s10 + $0xf0] sm:$0xff]   ;;  %v4320_v20 = vld [vmem:[%s4456_s10 + $0xe0] sm:$0xff]  }
 0x37a   : > { %v2060_v11 = vpop.f32.mrf.mxu1  ;;  %v2134_v5 = vpack.c.bf16 %v2003_v34, %v1999_v31  ;;  %v4514_v34 = vld [vmem:[#allocation5_spill] sm:$0xff]  ;;  %v4515_v31 = vld [vmem:[#allocation6_spill] sm:$0xff] }
 0x37b   : > { %v4210_v47 = vadd.f32 %v2060_v11, %v1707_v9  ;;  %v1993_v9 = vadd.f32 %v4085_v49, %v4053_v10 }
 0x37c   : > { %v2062_v32 = vpop.f32.mrf.mxu1  ;;  %2176 = vmatpush1.bf16.msra.mxu0 %v2138_v7 }
 0x37d   : > { %v4204_v16 = vadd.f32 %v2062_v32, %v1712_v51  ;;  %2177 = vmatprep.subr.bf16.mxu0 %v2137_v37  ;;  %v2132_v36 = vpack.c.bf16 %v1993_v9, %v1989_v35 }
 0x37e   : > { %v2064_v23 = vpop.f32.mrf.mxu1 }
 0x37f   : > { %v2146_v8 = vpack.c.bf16 %v4204_v16, %v4202_v2  ;;  %v4214_v12 = vadd.f32 %v2064_v23, %v1712_v51  ;;  %v2133_v51 = vpack.c.bf16 %v1995_v4, %v1991_v29  ;;  %v4332_v2 = vld [vmem:[%s4456_s10 + $0xd8] sm:$0xff]   ;;  %v3070_v16 = vld [vmem:[%s4456_s10 + $0x50] sm:$0xff]  }
 0x380   : > { %v4218_v60 = vpop.f32.mrf.mxu1  ;;  %2178 = vmatpush1.bf16.msra.mxu0 %v2136_v46  ;;  %2890 = vmatprep.subr.bf16.mxu1 %v3070_v16 }
 0x381   : > { %v2147_v53 = vpack.c.bf16 %v4214_v12, %v4210_v47  ;;  %2179 = vmatprep.subr.bf16.mxu0 %v2135_v45  ;;  %v4290_v47 = vld [vmem:[%s4456_s10 + $0xb8] sm:$0xff]   ;;  %v3071_v12 = vld [vmem:[%s4456_s10 + $0x10] sm:$0xff]  }
 0x382   : > { %v4226_v52 = vpop.f32.mrf.mxu1  ;;  %2891 = vmatpush3.bf16.msra.mxu1 %v3071_v12 }
 0x384   : > { %v4230_v22 = vpop.f32.mrf.mxu1  ;;  %2180 = vmatpush1.bf16.msra.mxu0 %v2134_v5 }
 0x385   : > { %2181 = vmatprep.subr.bf16.mxu0 %v2133_v51 }
 0x386   : > { %v2074_v27 = vpop.f32.mrf.mxu1 }
 0x388   : > { %v2078_v15 = vpop.f32.mrf.mxu1  ;;  %2182 = vmatpush1.bf16.msra.mxu0 %v2132_v36 }
 0x389   : > { %2183 = vmatprep.subr.bf16.mxu0 %v4510_v18 }
 0x38a   : > { %v2080_v10 = vpop.f32.mrf.mxu1 }
 0x38c   : > { %v2082_v49 = vpop.f32.mrf.mxu1  ;;  %2184 = vmatpush1.bf16.msra.mxu0 %v4511_v14 }
 0x38d   : > { %2185 = vmatprep.subr.bf16.mxu0 %v4512_v13 }
 0x38e   : > { %v2084_v19 = vpop.f32.mrf.mxu1 }
 0x390   : > { %v2088_v40 = vpop.f32.mrf.mxu1  ;;  %2186 = vmatpush1.bf16.msra.mxu0 %v4513_v43 }
 0x392   : > { %v2090_v57 = vpop.f32.mrf.mxu1 }
 0x394   : > { %v2092_v24 = vpop.f32.mrf.mxu1 }
 0x396   : > { %v2094_v62 = vpop.f32.mrf.mxu1 }
 0x398   : > { %v2098_v33 = vpop.f32.mrf.mxu1 }
 0x399   : > { %v2099_v35 = vadd.f32 %v2098_v33, %v4515_v31  ;;  %v4520_v33 = vld [vmem:[#allocation11_spill] sm:$0xff] }
 0x39a   : > { %v2100_v28 = vpop.f32.mrf.mxu1 }
 0x39b   : > { %v2101_v29 = vadd.f32 %v2100_v28, %v4515_v31 }
 0x39c   : > { %v2102_v44 = vpop.f32.mrf.mxu1 }
 0x39e   : > { %v2104_v0 = vpop.f32.mrf.mxu1 }
 0x39f   : > { %v2105_v46 = vadd.f32 %v2104_v0, %v4514_v34 }
 0x3a0   : > { %v2108_v25 = vpop.f32.mrf.mxu1 }
 0x3a1   : > { %v2109_v45 = vadd.f32 %v2108_v25, %v4108_v61  ;;  %v2155_v51 = vpack.c.bf16 %v2105_v46, %v2101_v29  ;;  %v4523_v29 = vld [vmem:[#allocation2_spill] sm:$0xff] }
 0x3a2   : > { %v2110_v26 = vpop.f32.mrf.mxu1 }
 0x3a3   : > { %v2111_v6 = vadd.f32 %v2110_v26, %v4108_v61  ;;  %v4518_v61 = vld [vmem:[#allocation9_spill] sm:$0xff]  ;;  %v2075_v26 = vadd.f32 %v2074_v27, %v4520_v33  ;;  %v4358_v27 = vld [vmem:[%s4456_s10 + $0x90] sm:$0xff]  }
 0x3a4   : > { %v2112_v30 = vpop.f32.mrf.mxu1  ;;  %v2085_v13 = vadd.f32 %v2084_v19, %v4518_v61  ;;  %v2073_v19 = vadd.f32 %v4230_v22, %v4520_v33  ;;  %v3072_v22 = vld [vmem:[%s4456_s10 + $0x48] sm:$0xff]  }
 0x3a5   : > { %v2113_v50 = vadd.f32 %v2112_v30, %v4101_v55  ;;  %2892 = vmatprep.subr.bf16.mxu1 %v3072_v22 }
 0x3a6   : > { %v2114_v38 = vpop.f32.mrf.mxu1 }
 0x3a7   : > { %v2115_v1 = vadd.f32 %v2114_v38, %v4101_v55  ;;  %v2156_v9 = vpack.c.bf16 %v2113_v50, %v2109_v45  ;;  %v4517_v55 = vld [vmem:[#allocation8_spill] sm:$0xff] }
 0x3a8   : > { %v2118_v21 = vpop.f32.mrf.mxu1  ;;  %v2091_v36 = vadd.f32 %v2090_v57, %v4517_v55  ;;  %v2089_v28 = vadd.f32 %v2088_v40, %v4517_v55 }
 0x3a9   : > { %v2119_v37 = vadd.f32 %v2118_v21, %v4093_v39  ;;  %v2157_v23 = vpack.c.bf16 %v2115_v1, %v2111_v6  ;;  %v4385_v1 = vld [vmem:[%s4456_s10 + $0xc0] sm:$0xff]  }
 0x3aa   : > { %v2120_v58 = vpop.f32.mrf.mxu1 }
 0x3ab   : > { %v2121_v56 = vadd.f32 %v2120_v58, %v4093_v39  ;;  %v4516_v39 = vld [vmem:[#allocation7_spill] sm:$0xff]  ;;  %v3075_v58 = vld [vmem:[%s4456_s10 + $0x40] sm:$0xff]  }
 0x3ac   : > { %v2122_v54 = vpop.f32.mrf.mxu1  ;;  %v2095_v5 = vadd.f32 %v2094_v62, %v4516_v39  ;;  %v2093_v18 = vadd.f32 %v2092_v24, %v4516_v39  ;;  %v2083_v62 = vadd.f32 %v2082_v49, %v4518_v61  ;;  %v4521_v24 = vld [vmem:[#allocation12_spill] sm:$0xff] }
 0x3ad   : > { %v2123_v7 = vadd.f32 %v2122_v54, %v4091_v17  ;;  %v2071_v38 = vadd.f32 %v4226_v52, %v4521_v24  ;;  %v3074_v52 = vld [vmem:[%s4456_s10 + $0xf8] sm:$0xff]   ;;  %v3077_v54 = vld [vmem:[%s4456_s10] sm:$0xff]  }
 0x3ae   : > { %v2124_v11 = vpop.f32.mrf.mxu1  ;;  %v2153_v43 = vpack.c.bf16 %v2095_v5, %v2091_v36  ;;  %v2152_v25 = vpack.c.bf16 %v2093_v18, %v2089_v28  ;;  %v2215_v36 = vld [vmem:[%s4455_s9 + $0x8] sm:$0xff]  ;;  %v2830_v18 = vld [vmem:[%s4455_s9 + $0x18] sm:$0xff] }
 0x3af   : > { %v2125_v42 = vadd.f32 %v2124_v11, %v4091_v17  ;;  %v2158_v4 = vpack.c.bf16 %v2123_v7, %v2119_v37  ;;  %v2103_v17 = vadd.f32 %v2102_v44, %v4514_v34  ;;  %v4519_v44 = vld [vmem:[#allocation10_spill] sm:$0xff]  ;;  %v2149_v21 = vpack.c.bf16 %v2075_v26, %v2071_v38  ;;  %v4374_v7 = vld [vmem:[%s4456_s10 + $0xc8] sm:$0xff]  }
 0x3b0   : > { %v2081_v0 = vadd.f32 %v2080_v10, %v4519_v44  ;;  %v2079_v57 = vadd.f32 %v2078_v15, %v4519_v44  ;;  %v2069_v10 = vadd.f32 %v4218_v60, %v4521_v24  ;;  %v4522_v60 = vld [vmem:[#allocation4_spill] sm:$0xff]  ;;  %v3073_v15 = vld [vmem:[%s4456_s10 + $0x8] sm:$0xff]  }
 0x3b1   : > { %v2159_v32 = vpack.c.bf16 %v2125_v42, %v2121_v56  ;;  %v2154_v14 = vpack.c.bf16 %v2103_v17, %v2099_v35  ;;  %2893 = vmatpush3.bf16.msra.mxu1 %v3073_v15  ;;  %v4379_v11 = vld [vmem:[%s4456_s10 + $0x88] sm:$0xff]   ;;  %v4391_v56 = vld [vmem:[%s4456_s10 + $0x80] sm:$0xff]  }
 0x3b2   : > { %v2151_v30 = vpack.c.bf16 %v2085_v13, %v2081_v0  ;;  %v2150_v40 = vpack.c.bf16 %v2083_v62, %v2079_v57  ;;  %v2148_v49 = vpack.c.bf16 %v2073_v19, %v2069_v10  ;;  %2894 = vmatprep.subr.bf16.mxu1 %v3075_v58  ;;  %v2214_v35 = vld [vmem:[%s4455_s9] sm:$0xff]  ;;  %v2832_v28 = vld [vmem:[%s4455_s9 + $0x28] sm:$0xff] }
 0x3b3   : > { %2187 = vmatprep.subr.bf16.mxu0 %v2159_v32 }
 0x3b4   : > { %2188 = vmatpush2.bf16.msra.mxu0 %v2158_v4 }
 0x3b5   : > { %2189 = vmatprep.subr.bf16.mxu0 %v2157_v23  ;;  %2895 = vmatpush3.bf16.msra.mxu1 %v3077_v54 }
 0x3b6   : > { %2936 = vmatprep.subr.bf16.mxu1 %v3074_v52 }
 0x3b8   : > { %2190 = vmatpush2.bf16.msra.mxu0 %v2156_v9  ;;  %v4524_v9 = vld [vmem:[#allocation3_spill] sm:$0xff] }
 0x3b9   : > { %2191 = vmatprep.subr.bf16.mxu0 %v2155_v51 }
 0x3bc   : > { %2192 = vmatpush2.bf16.msra.mxu0 %v2154_v14  ;;  %v2831_v14 = vld [vmem:[%s4455_s9 + $0x20] sm:$0xff] }
 0x3bd   : > { %2193 = vmatprep.subr.bf16.mxu0 %v2153_v43  ;;  %v2216_v43 = vld [vmem:[%s4455_s9 + $0x10] sm:$0xff] }
 0x3c0   : > { %2194 = vmatpush2.bf16.msra.mxu0 %v2152_v25 }
 0x3c1   : > { %2195 = vmatprep.subr.bf16.mxu0 %v2151_v30 }
 0x3c4   : > { %2196 = vmatpush2.bf16.msra.mxu0 %v2150_v40 }
 0x3c5   : > { %2197 = vmatprep.subr.bf16.mxu0 %v2149_v21 }
 0x3c8   : > { %2198 = vmatpush2.bf16.msra.mxu0 %v2148_v49 }
 0x3c9   : > { %2199 = vmatprep.subr.bf16.mxu0 %v2147_v53  ;;  %v4350_v53 = vld [vmem:[%s4456_s10 + $0xd0] sm:$0xff]  }
 0x3cc   : > { %2200 = vmatpush2.bf16.msra.mxu0 %v2146_v8  ;;  %v4340_v8 = vld [vmem:[%s4456_s10 + $0x98] sm:$0xff]  }
 0x3cd   : > { %2201 = vmatprep.subr.bf16.mxu0 %v2145_v3  ;;  %v4325_v3 = vld [vmem:[%s4456_s10 + $0xa0] sm:$0xff]  }
 0x3d0   : > { %2202 = vmatpush2.bf16.msra.mxu0 %v2144_v63  ;;  %v4313_v63 = vld [vmem:[%s4456_s10 + $0xa8] sm:$0xff]  }
 0x3d1   : > { %2908 = vmatprep.subr.bf16.mxu0 %v3074_v52 }
 0x3d3   : > { %2204 = vmatmul.mubr.bf16.vlgmr.msra.gmra.mxu0 %v4522_v60 }
 0x3d4   : > { %2909 = vmatpush3.bf16.msra.mxu0 %v4290_v47 }
 0x3d5   : > { %2910 = vmatprep.subr.bf16.mxu0 %v4296_v48 }
 0x3d8   : > { %2911 = vmatpush3.bf16.msra.mxu0 %v4301_v41 }
 0x3d9   : > { %2912 = vmatprep.subr.bf16.mxu0 %v4308_v59 }
 0x3dc   : > { %2913 = vmatpush3.bf16.msra.mxu0 %v4313_v63 }
 0x3dd   : > { %2914 = vmatprep.subr.bf16.mxu0 %v4320_v20 }
 0x3e0   : > { %2915 = vmatpush3.bf16.msra.mxu0 %v4325_v3 }
 0x3e1   : > { %2916 = vmatprep.subr.bf16.mxu0 %v4332_v2 }
 0x3e4   : > { %2917 = vmatpush3.bf16.msra.mxu0 %v4340_v8 }
 0x3e5   : > { %2918 = vmatprep.subr.bf16.mxu0 %v4350_v53 }
 0x3e8   : > { %2919 = vmatpush3.bf16.msra.mxu0 %v4358_v27 }
 0x3e9   : > { %2920 = vmatprep.subr.bf16.mxu0 %v4374_v7 }
 0x3ec   : > { %2921 = vmatpush3.bf16.msra.mxu0 %v4379_v11 }
 0x3ed   : > { %2922 = vmatprep.subr.bf16.mxu0 %v4385_v1 }
 0x3f0   : > { %2923 = vmatpush3.bf16.msra.mxu0 %v4391_v56 }
 0x493   : > { %v2205_v42 = vpop.f32.mrf.mxu0 }
 0x494   : > { %v2212_v37 = vpack.c.bf16 %v2205_v42, %v2205_v42 }
 0x495   : > { %v2207_v6 = vpop.f32.mrf.mxu0 }
 0x496   : > { %v2222_v32 = vpack.i.b16 %v2212_v37, %v2212_v37  ;;  %v2264_v50 = vshrl.u32 %v2212_v37, 16  ;;  %v2213_v4 = vpack.c.bf16 %v2207_v6, %v2207_v6 }
 0x497   : > { %v2209_v34 = vpop.f32.mrf.mxu0 }
 0x498   : > { %v2229_v46 = vpack.i.b16 %v2213_v4, %v2213_v4  ;;  %v2265_v23 = vpack.i.b16 %v2264_v50, %v2264_v50  ;;  %v2271_v45 = vshrl.u32 %v2213_v4, 16  ;;  %v2227_v17 = vrot.slane %v2222_v32, %v4523_v29 }
 0x499   : > { %v2210_v31 = vpop.f32.mrf.mxu0  ;;  %v2247_v39 = vrot.slane %v2222_v32, %v4524_v9 }
 0x49a   : > { %v2234_v5 = vrot.slane %v2229_v46, %v4523_v29  ;;  %v2251_v51 = vrot.slane %v2229_v46, %v4524_v9  ;;  %v2272_v55 = vpack.i.b16 %v2271_v45, %v2271_v45  ;;  %v2270_v44 = vrot.slane %v2265_v23, %v4523_v29 }
 0x49b   : > { %v2290_v0 = vrot.slane %v2265_v23, %v4524_v9 }
 0x49c   : > { %v2833_v61 = vcombine.low %v2227_v17, %v2234_v5  ;;  %v2834_v13 = vcombine.low %v2247_v39, %v2251_v51  ;;  %v2277_v62 = vrot.slane %v2272_v55, %v4523_v29  ;;  %v2294_v25 = vrot.slane %v2272_v55, %v4524_v9 }
 0x49e   : > { %v2241_v33 = vmul.bf16 %v2833_v61, %v2214_v35  ;;  %v2242_v26 = vmul.bf16 %v2833_v61, %v2215_v36  ;;  %v2258_v30 = vmul.bf16 %v2834_v13, %v2830_v18  ;;  %v2259_v57 = vmul.bf16 %v2834_v13, %v2831_v14 }
 0x49f   : > { %v2835_v24 = vcombine.low %v2270_v44, %v2277_v62  ;;  %v2836_v38 = vcombine.low %v2290_v0, %v2294_v25  ;;  %v2243_v19 = vmul.bf16 %v2833_v61, %v2216_v43  ;;  %v2260_v40 = vmul.bf16 %v2834_v13, %v2832_v28 }
 0x4a0   : > { %v2261_v21 = vadd.bf16 %v2258_v30, %v2241_v33  ;;  %v2262_v10 = vadd.bf16 %v2259_v57, %v2242_v26 }
 0x4a1   : > { %v2263_v49 = vadd.bf16 %v2260_v40, %v2243_v19  ;;  %v2284_v60 = vmul.bf16 %v2835_v24, %v2214_v35  ;;  %v2285_v52 = vmul.bf16 %v2835_v24, %v2215_v36  ;;  %v2301_v16 = vmul.bf16 %v2836_v38, %v2830_v18 }
 0x4a2   : > { %v2837_v12 = vcombine.low %v2261_v21, %v2262_v10  ;;  %v2838_v22 = vcombine.high %v2261_v21, %v2262_v10  ;;  %v2302_v15 = vmul.bf16 %v2836_v38, %v2831_v14  ;;  %v2286_v37 = vmul.bf16 %v2835_v24, %v2216_v43 }
 0x4a3   : > { %v2304_v58 = vadd.bf16 %v2301_v16, %v2284_v60  ;;  %v2840_v54 = vcombine.high %v2263_v49, %v2263_v49  ;;  %v2303_v6 = vmul.bf16 %v2836_v38, %v2832_v28  ;;  %v2839_v34 = vcombine.low %v2263_v49, %v2263_v49 }
 0x4a4   : > { %2636 = vmatprep.mubr.bf16.mxu1 %v2838_v22  ;;  %v2305_v42 = vadd.bf16 %v2302_v15, %v2285_v52 }
 0x4a5   : > { %2637 = vmatmul.mubr.bf16.vlgmr.msra.gmra.mxu1 %v2837_v12  ;;  %v2306_v4 = vadd.bf16 %v2303_v6, %v2286_v37 }
 0x4a6   : > { %2944 = vmatpush3.bf16.msra.mxu1 %v4290_v47  ;;  %2644 = vmatprep.mubr.bf16.mxu1 %v2840_v54  ;;  %v2842_v32 = vcombine.high %v2304_v58, %v2305_v42  ;;  %v2841_v50 = vcombine.low %v2304_v58, %v2305_v42 }
 0x4a7   : > { %2937 = vmatprep.subr.bf16.mxu1 %v4296_v48  ;;  %v2844_v46 = vcombine.high %v2306_v4, %v2306_v4  ;;  %v2843_v47 = vcombine.low %v2306_v4, %v2306_v4 }
 0x4a8   : > { %2684 = vmatprep.mubr.bf16.mxu0 %v2842_v32 }
 0x4a9   : > { %2685 = vmatmul.mubr.bf16.vlgmr.msra.gmra.mxu0 %v2841_v50 }
 0x4aa   : > { %2945 = vmatpush3.bf16.msra.mxu1 %v4301_v41  ;;  %v2845_v41 = vld [vmem:[%s4454_s8] ss:$0 sm:$0xff] }
 0x4ab   : > { %2938 = vmatprep.subr.bf16.mxu1 %v4308_v59 }
 0x4ad   : > { %2645 = vmatmul.mubr.bf16.gmra.mxu1 %v2839_v34 }
 0x4ae   : > { %2946 = vmatpush3.bf16.msra.mxu1 %v4313_v63  ;;  %2692 = vmatprep.mubr.bf16.mxu1 %v2844_v46 }
 0x4af   : > { %2939 = vmatprep.subr.bf16.mxu1 %v4320_v20 }
 0x4b2   : > { %2947 = vmatpush3.bf16.msra.mxu1 %v4325_v3 }
 0x4b3   : > { %2940 = vmatprep.subr.bf16.mxu1 %v4332_v2 }
 0x4b6   : > { %2948 = vmatpush3.bf16.msra.mxu1 %v4340_v8 }
 0x4b7   : > { %2941 = vmatprep.subr.bf16.mxu1 %v4350_v53 }
 0x4ba   : > { %2949 = vmatpush3.bf16.msra.mxu1 %v4358_v27 }
 0x4bb   : > { %2942 = vmatprep.subr.bf16.mxu1 %v4374_v7 }
 0x4be   : > { %2950 = vmatpush3.bf16.msra.mxu1 %v4379_v11 }
 0x4bf   : > { %2943 = vmatprep.subr.bf16.mxu1 %v4385_v1 }
 0x4c2   : > { %2951 = vmatpush3.bf16.msra.mxu1 %v4391_v56 }
 0x4c5   : > { %2693 = vmatmul.mubr.bf16.vlgmr.msra.gmra.mxu1 %v2843_v47 }
 0x565   : > { %v2896_v48 = vpop.f32.mrf.mxu1 }
 0x567   : > { %v2897_v59 = vpop.f32.mrf.mxu1 }
 0x568   : > { %v2898_v63 = vadd.f32 %v2897_v59, %v2896_v48 }
 0x569   : > { %v2899_v20 = vpop.f32.mrf.mxu1  ;;  %v2924_v3 = vpop.f32.mrf.mxu0 }
 0x56a   : > { %v2639_v2 = vadd.f32 %v2898_v63, %v2845_v41 }
 0x56b   : > { %v2900_v8 = vpop.f32.mrf.mxu1  ;;  %v2925_v53 = vpop.f32.mrf.mxu0 }
 0x56c   : > { %v2901_v27 = vadd.f32 %v2900_v8, %v2899_v20  ;;  %v2926_v7 = vadd.f32 %v2925_v53, %v2924_v3 }
 0x56d   : > { %v2902_v11 = vpop.f32.mrf.mxu1  ;;  %v2927_v1 = vpop.f32.mrf.mxu0 }
 0x56e   : > { %v2642_v56 = vadd.f32 %v2901_v27, %v2845_v41  ;;  %v2687_v23 = vadd.f32 %v2926_v7, %v2639_v2 }
 0x56f   : > { %v2903_v45 = vpop.f32.mrf.mxu1  ;;  %v2928_v31 = vpop.f32.mrf.mxu0 }
 0x570   : > { %2700 = vst [vmem:[%s383_s12] sm:$0xff] %v2687_v23  ;;  %v2929_v29 = vadd.f32 %v2928_v31, %v2927_v1  ;;  %v2904_v5 = vadd.f32 %v2903_v45, %v2902_v11 }
 0x571   : > { %v2905_v17 = vpop.f32.mrf.mxu1 }
 0x572   : > { %v2690_v9 = vadd.f32 %v2929_v29, %v2642_v56  ;;  %v2647_v55 = vadd.f32 %v2904_v5, %v2845_v41 }
 0x573   : > { %v2906_v39 = vpop.f32.mrf.mxu1 }
 0x574   : > { %2701 = vst [vmem:[%s383_s12 + $0x8] sm:$0xff] %v2690_v9 }
 0x585   : > { %v2930_v51 = vpop.f32.mrf.mxu1 }
 0x587   : > { %v2931_v35 = vpop.f32.mrf.mxu1 }
 0x588   : > { %v2932_v36 = vadd.f32 %v2931_v35, %v2930_v51 }
 0x589   : > { %v2933_v18 = vpop.f32.mrf.mxu1 }
 0x58a   : > { %v2695_v14 = vadd.f32 %v2932_v36, %v2647_v55 }
 0x58b   : > { %v2934_v61 = vpop.f32.mrf.mxu1 }
 0x58c   : > { %2702 = vst [vmem:[%s383_s12 + $0x10] sm:$0xff] %v2695_v14 }
 0x58d PF: > { %s21_s17 = sadd.s32 1, %s3098_s17  }
 0x58e   : > { %p18_p4 = scmp.ge.s32.totalorder %s21_s17, 4  }
 0x590   :  { %20 = sbr.rel (!%p18_p4) target bundleno = 1 (0x1), region = 95 }

</bundles_post_ra>
